<compile_context>
chip_gen: v7x
topology: tpu7x:2x2x1
jax: 0.10.0
libtpu: 0.0.40
codegen_flags: <defaults>
</compile_context>

<pallas_src>
import math
from functools import partial

import jax
import jax.numpy as jnp
from jax.experimental import pallas as pl
from jax.experimental.pallas import tpu as pltpu


def _layer_norm(x, gamma, beta, eps=1e-5):
    mean = jnp.mean(x, axis=-1, keepdims=True)
    var = jnp.mean((x - mean) ** 2, axis=-1, keepdims=True)
    return (x - mean) * jax.lax.rsqrt(var + eps) * gamma + beta


def _encoder_kernel(nhead, num_layers, b_blk, seq_len,
                    x_ref,
                    wq_ref, wk_ref, wv_ref, bq_ref, bk_ref, bv_ref,
                    wo_ref, bo_ref,
                    w1_ref, b1_ref, w2_ref, b2_ref,
                    g1_ref, be1_ref, g2_ref, be2_ref,
                    o_ref, attn_ref,
                    x_scr, cat_scr):
    """One grid step = one block of sequences x one transformer layer.

    Grid = (batch_blocks, num_layers); the layer axis is innermost ("arbitrary") and the
    residual stream is carried in VMEM scratch across it. Weights are per-layer blocks.
    """
    l = pl.program_id(1)
    D = x_ref.shape[-1]
    dh = D // nhead
    M = b_blk * seq_len
    f32, bf16 = jnp.float32, jnp.bfloat16

    # Load the residual stream into VMEM scratch at the first layer of this batch block.
    @pl.when(l == 0)
    def _():
        x_scr[...] = x_ref[...].astype(f32)

    x = x_scr[...]                          # (M, D) f32 residual stream
    x_bf = x.astype(bf16)

    # ---- fused-head Q/K/V projections: heads packed into the N dimension ----
    # (scale 1/sqrt(dh) pre-folded into wq/bq on the host)
    q = jnp.dot(x_bf, wq_ref[0], preferred_element_type=f32) + bq_ref[0]   # (M, D)
    k = jnp.dot(x_bf, wk_ref[0], preferred_element_type=f32) + bk_ref[0]   # (M, D)
    v = jnp.dot(x_bf, wv_ref[0], preferred_element_type=f32) + bv_ref[0]   # (M, D)

    attn_acc = jnp.zeros((b_blk, seq_len, seq_len), f32)

    for h in range(nhead):                  # static unroll over heads
        c0 = h * dh
        qh = q[:, c0:c0 + dh].reshape(b_blk, seq_len, dh).astype(bf16)
        kh = k[:, c0:c0 + dh].reshape(b_blk, seq_len, dh).astype(bf16)
        vh = v[:, c0:c0 + dh].reshape(b_blk, seq_len, dh).astype(bf16)

        # scores = q @ k^T per sequence (batched over the b_blk axis); scale pre-folded.
        s = jnp.einsum('bqd,bkd->bqk', qh, kh,
                       preferred_element_type=f32)                 # (b_blk, S, S)
        s = s - jnp.max(s, axis=-1, keepdims=True)
        p = jnp.exp(s)
        p = p * pl.reciprocal(jnp.sum(p, axis=-1, keepdims=True), approx=True)
        attn_acc = attn_acc + p

        oh = jnp.einsum('bqk,bkd->bqd', p.astype(bf16), vh,
                        preferred_element_type=f32)                # (b_blk, S, dh)
        # concat buffer: head h occupies lanes [h*dh, (h+1)*dh)
        cat_scr[:, c0:c0 + dh] = oh.reshape(M, dh)

    # out-projection as ONE (M,D)@(D,D) matmul on the concatenated heads
    attn_out = jnp.dot(cat_scr[...].astype(bf16), wo_ref[0],
                       preferred_element_type=f32) + bo_ref[0]

    # residual + LayerNorm1
    x1 = _layer_norm(x + attn_out, g1_ref[0], be1_ref[0])

    # feed-forward: Linear1 -> ReLU -> Linear2
    hdn = jnp.maximum(
        jnp.dot(x1.astype(bf16), w1_ref[0], preferred_element_type=f32) + b1_ref[0],
        0.0)
    ff = jnp.dot(hdn.astype(bf16), w2_ref[0], preferred_element_type=f32) + b2_ref[0]

    # residual + LayerNorm2, written back to the carried residual stream
    x2 = _layer_norm(x1 + ff, g2_ref[0], be2_ref[0])
    x_scr[...] = x2

    # Only the last layer's output / head-averaged attention map leaves the chip.
    @pl.when(l == num_layers - 1)
    def _():
        o_ref[...] = x2.astype(o_ref.dtype)
        attn_ref[...] = (attn_acc * (1.0 / nhead)).astype(attn_ref.dtype)


def _stack_layer_params(layer_params, nhead):
    """Host-side weight prep (done once outside the kernel):
       - pre-transpose every matmul weight to plain `x @ w` layout,
       - fold the 1/sqrt(dh) attention scale into the Q projection,
       - cast matmul weights to bf16, keep biases / LayerNorm params in f32,
       - stack along a leading num_layers axis so each layer is one streamed block."""
    D = layer_params[0]["w_in"].shape[1]
    dh = D // nhead
    scale = 1.0 / math.sqrt(dh)
    bf16, f32 = jnp.bfloat16, jnp.float32

    def per_layer(p):
        w_in, b_in = p["w_in"], p["b_in"]
        return dict(
            wq=(w_in[:D].T * scale).astype(bf16),          # (D, D), scale folded
            wk=w_in[D:2 * D].T.astype(bf16),
            wv=w_in[2 * D:].T.astype(bf16),
            bq=(b_in[:D] * scale).reshape(1, D).astype(f32),
            bk=b_in[D:2 * D].reshape(1, D).astype(f32),
            bv=b_in[2 * D:].reshape(1, D).astype(f32),
            wo=p["w_out"].T.astype(bf16),                  # (D, D)
            bo=p["b_out"].reshape(1, D).astype(f32),
            w1=p["w1"].T.astype(bf16),                     # (D, dff)
            b1=p["b1"].reshape(1, -1).astype(f32),
            w2=p["w2"].T.astype(bf16),                     # (dff, D)
            b2=p["b2"].reshape(1, D).astype(f32),
            g1=p["g1"].reshape(1, D).astype(f32),
            be1=p["be1"].reshape(1, D).astype(f32),
            g2=p["g2"].reshape(1, D).astype(f32),
            be2=p["be2"].reshape(1, D).astype(f32),
        )

    per = [per_layer(p) for p in layer_params]
    keys = ["wq", "wk", "wv", "bq", "bk", "bv", "wo", "bo",
            "w1", "b1", "w2", "b2", "g1", "be1", "g2", "be2"]
    return [jnp.stack([pp[k] for pp in per], axis=0) for k in keys]


def my_transformer_encoder(src, layer_params, nhead, b_blk=None):
    """Equivalent of MyTransformerEncoder.forward(src, mask=None, src_key_padding_mask=None)
    with norm=None.  Grid = (batch_blocks, num_layers): weights streamed per layer,
    residual carried on-chip across layers; only the last layer's attention map is written."""
    B, S, D = src.shape
    num_layers = len(layer_params)
    dh = D // nhead
    dff = layer_params[0]["w1"].shape[0]
    weights = _stack_layer_params(layer_params, nhead)

    # Pick a batch block so the matmul M dimension approaches a full MXU pass (>=128 rows
    # where the batch allows it) while dividing B evenly.
    if b_blk is None:
        b_blk = max(1, min(B, max(1, 128 // S)))
        while B % b_blk:
            b_blk -= 1
    nb = B // b_blk
    M = b_blk * S

    # Flatten (B,S,D) -> (B*S,D) on the host so activation blocks are plain row slabs.
    src2d = src.reshape(B * S, D)

    def wspec(a):
        nd = a.ndim
        return pl.BlockSpec((1,) + a.shape[1:],
                            lambda b, l, _nd=nd: (l,) + (0,) * (_nd - 1))

    flops_per_layer = (
        2 * B * S * D * D * 3            # QKV projections
        + 2 * B * nhead * S * S * dh     # scores
        + 2 * B * nhead * S * S * dh     # P @ V
        + 2 * B * S * D * D              # out-projection
        + 2 * B * S * D * dff * 2        # FFN
    )
    cost = pl.CostEstimate(
        flops=num_layers * flops_per_layer,
        transcendentals=num_layers * B * nhead * S * S,
        bytes_accessed=int(src.size * 4 + B * S * D * 4 + B * S * S * 4
                           + sum(int(a.size) * a.dtype.itemsize for a in weights)),
    )

    out2d, attn = pl.pallas_call(
        partial(_encoder_kernel, nhead, num_layers, b_blk, S),
        out_shape=(jax.ShapeDtypeStruct((B * S, D), jnp.float32),
                   jax.ShapeDtypeStruct((B, S, S), jnp.float32)),
        grid_spec=pltpu.PrefetchScalarGridSpec(
            num_scalar_prefetch=0,
            grid=(nb, num_layers),          # batch blocks (parallel) x layers (arbitrary)
            in_specs=[pl.BlockSpec((M, D), lambda b, l: (b, 0))]
                     + [wspec(a) for a in weights],
            out_specs=[pl.BlockSpec((M, D), lambda b, l: (b, 0)),
                       pl.BlockSpec((b_blk, S, S), lambda b, l: (b, 0, 0))],
            scratch_shapes=[pltpu.VMEM((M, D), jnp.float32),   # residual stream carry
                            pltpu.VMEM((M, D), jnp.float32)],  # head-concat buffer
        ),
        compiler_params=pltpu.CompilerParams(
            dimension_semantics=("parallel", "arbitrary"),
            vmem_limit_bytes=48 * 1024 * 1024),
        cost_estimate=cost,
    )(src2d, *weights)
    return out2d.reshape(B, S, D), attn


# ------------------------- pure-JAX f32 reference (for sanity check) -------------------------
def _ref_layer(x, p, nhead):
    B, S, D = x.shape
    dh = D // nhead
    qkv = jnp.einsum('bsd,ed->bse', x, p["w_in"]) + p["b_in"]
    q, k, v = qkv[..., :D], qkv[..., D:2 * D], qkv[..., 2 * D:]
    qh = q.reshape(B, S, nhead, dh)
    kh = k.reshape(B, S, nhead, dh)
    vh = v.reshape(B, S, nhead, dh)
    s = jnp.einsum('bqhd,bkhd->bhqk', qh, kh) / math.sqrt(dh)
    pw = jax.nn.softmax(s, axis=-1)
    oh = jnp.einsum('bhqk,bkhd->bqhd', pw, vh).reshape(B, S, D)
    attn_out = jnp.einsum('bsd,ed->bse', oh, p["w_out"]) + p["b_out"]

    def ln(y, g, b):
        m = jnp.mean(y, -1, keepdims=True)
        var = jnp.mean((y - m) ** 2, -1, keepdims=True)
        return (y - m) / jnp.sqrt(var + 1e-5) * g + b

    x1 = ln(x + attn_out, p["g1"], p["be1"])
    h = jax.nn.relu(jnp.einsum('bsd,fd->bsf', x1, p["w1"]) + p["b1"])
    ff = jnp.einsum('bsf,df->bsd', h, p["w2"]) + p["b2"]
    x2 = ln(x1 + ff, p["g2"], p["be2"])
    return x2, jnp.mean(pw, axis=1)


def _ref_encoder(src, layer_params, nhead):
    out, attn = src, None
    for p in layer_params:
        out, attn = _ref_layer(out, p, nhead)
    return out, attn


# ------------------------------------- setup / main -------------------------------------
def init_layer_params(key, d_model, nhead, dim_feedforward):
    ks = jax.random.split(key, 6)
    s = 0.02
    return {
        "w_in": s * jax.random.normal(ks[0], (3 * d_model, d_model), jnp.float32),
        "b_in": jnp.zeros((3 * d_model,), jnp.float32),
        "w_out": s * jax.random.normal(ks[1], (d_model, d_model), jnp.float32),
        "b_out": jnp.zeros((d_model,), jnp.float32),
        "w1": s * jax.random.normal(ks[2], (dim_feedforward, d_model), jnp.float32),
        "b1": 0.01 * jax.random.normal(ks[3], (dim_feedforward,), jnp.float32),
        "w2": s * jax.random.normal(ks[4], (d_model, dim_feedforward), jnp.float32),
        "b2": 0.01 * jax.random.normal(ks[5], (d_model,), jnp.float32),
        "g1": jnp.ones((d_model,), jnp.float32),
        "be1": jnp.zeros((d_model,), jnp.float32),
        "g2": jnp.ones((d_model,), jnp.float32),
        "be2": jnp.zeros((d_model,), jnp.float32),
    }


if __name__ == "__main__":
    B, S, D = 2, 8, 32
    NHEAD = 4
    DFF = 64
    NUM_LAYERS = 2

    key = jax.random.PRNGKey(0)
    k_src, *k_layers = jax.random.split(key, NUM_LAYERS + 1)
    src = jax.random.normal(k_src, (B, S, D), jnp.float32)
    layer_params = [init_layer_params(k, D, NHEAD, DFF) for k in k_layers]

    out, attn = my_transformer_encoder(src, layer_params, NHEAD)
    out = jax.block_until_ready(out)
    attn = jax.block_until_ready(attn)

    ref_out, ref_attn = _ref_encoder(src, layer_params, NHEAD)
    assert out.shape == (B, S, D) and attn.shape == (B, S, S)
    # bf16 matmuls + approx reciprocal softmax inside the kernel -> loosened tolerance
    # vs the pure-f32 reference (attention rows sum to ~1 within EUP approx error).
    assert jnp.allclose(out, ref_out, atol=2e-2, rtol=2e-2), "output mismatch"
    assert jnp.allclose(attn, ref_attn, atol=2e-2, rtol=2e-2), "attention mismatch"

    print("KERNEL_OK")
</pallas_src>

<mosaic_0001>
module attributes {stable_mosaic.version = 11 : i64} {
  func.func @_encoder_kernel(%arg0: i32, %arg1: i32, %arg2: memref<16x32xf32, #tpu.memory_space<vmem>>, %arg3: memref<1x32x32xbf16, #tpu.memory_space<vmem>>, %arg4: memref<1x32x32xbf16, #tpu.memory_space<vmem>>, %arg5: memref<1x32x32xbf16, #tpu.memory_space<vmem>>, %arg6: memref<1x1x32xf32, #tpu.memory_space<vmem>>, %arg7: memref<1x1x32xf32, #tpu.memory_space<vmem>>, %arg8: memref<1x1x32xf32, #tpu.memory_space<vmem>>, %arg9: memref<1x32x32xbf16, #tpu.memory_space<vmem>>, %arg10: memref<1x1x32xf32, #tpu.memory_space<vmem>>, %arg11: memref<1x32x64xbf16, #tpu.memory_space<vmem>>, %arg12: memref<1x1x64xf32, #tpu.memory_space<vmem>>, %arg13: memref<1x64x32xbf16, #tpu.memory_space<vmem>>, %arg14: memref<1x1x32xf32, #tpu.memory_space<vmem>>, %arg15: memref<1x1x32xf32, #tpu.memory_space<vmem>>, %arg16: memref<1x1x32xf32, #tpu.memory_space<vmem>>, %arg17: memref<1x1x32xf32, #tpu.memory_space<vmem>>, %arg18: memref<1x1x32xf32, #tpu.memory_space<vmem>>, %arg19: memref<16x32xf32, #tpu.memory_space<vmem>>, %arg20: memref<2x8x8xf32, #tpu.memory_space<vmem>>, %arg21: memref<16x32xf32, #tpu.memory_space<vmem>>, %arg22: memref<16x32xf32, #tpu.memory_space<vmem>>) attributes {dimension_semantics = [#tpu.dimension_semantics<parallel>, #tpu.dimension_semantics<arbitrary>], iteration_bounds = array<i64: 1, 2>, scalar_prefetch = 0 : i64, scratch_operands = 2 : i64, tpu.core_type = #tpu.core_type<tc>, window_params = [{transform_indices = @transform_0, window_bounds = array<i64: 16, 32>}, {transform_indices = @transform_1, window_bounds = array<i64: 1, 32, 32>}, {transform_indices = @transform_2, window_bounds = array<i64: 1, 32, 32>}, {transform_indices = @transform_3, window_bounds = array<i64: 1, 32, 32>}, {transform_indices = @transform_4, window_bounds = array<i64: 1, 1, 32>}, {transform_indices = @transform_5, window_bounds = array<i64: 1, 1, 32>}, {transform_indices = @transform_6, window_bounds = array<i64: 1, 1, 32>}, {transform_indices = @transform_7, window_bounds = array<i64: 1, 32, 32>}, {transform_indices = @transform_8, window_bounds = array<i64: 1, 1, 32>}, {transform_indices = @transform_9, window_bounds = array<i64: 1, 32, 64>}, {transform_indices = @transform_10, window_bounds = array<i64: 1, 1, 64>}, {transform_indices = @transform_11, window_bounds = array<i64: 1, 64, 32>}, {transform_indices = @transform_12, window_bounds = array<i64: 1, 1, 32>}, {transform_indices = @transform_13, window_bounds = array<i64: 1, 1, 32>}, {transform_indices = @transform_14, window_bounds = array<i64: 1, 1, 32>}, {transform_indices = @transform_15, window_bounds = array<i64: 1, 1, 32>}, {transform_indices = @transform_16, window_bounds = array<i64: 1, 1, 32>}, {transform_indices = @transform_17, window_bounds = array<i64: 16, 32>}, {transform_indices = @transform_18, window_bounds = array<i64: 2, 8, 8>}]} {
    %c0_i32 = arith.constant 0 : i32
    %0 = arith.cmpi eq, %arg1, %c0_i32 : i32
    %1 = arith.extui %0 : i1 to i32
    %c0_i32_0 = arith.constant 0 : i32
    %2 = arith.cmpi ne, %1, %c0_i32_0 : i32
    scf.if %2 {
      %c0_93 = arith.constant 0 : index
      %c0_94 = arith.constant 0 : index
      %212 = vector.load %arg2[%c0_93, %c0_94] : memref<16x32xf32, #tpu.memory_space<vmem>>, vector<16x32xf32>
      %c0_95 = arith.constant 0 : index
      %c0_96 = arith.constant 0 : index
      %213 = vector.load %arg21[%c0_95, %c0_96] : memref<16x32xf32, #tpu.memory_space<vmem>>, vector<16x32xf32>
      tpu.vector_store %arg21[%c0_95, %c0_96], %212 {strides = array<i32>} : memref<16x32xf32, #tpu.memory_space<vmem>>, vector<16x32xf32>,
    } else {
    }
    %c0 = arith.constant 0 : index
    %c0_1 = arith.constant 0 : index
    %3 = vector.load %arg21[%c0, %c0_1] : memref<16x32xf32, #tpu.memory_space<vmem>>, vector<16x32xf32>
    %4 = arith.truncf %3 : vector<16x32xf32> to vector<16x32xbf16>
    %c0_2 = arith.constant 0 : index
    %c0_3 = arith.constant 0 : index
    %c0_4 = arith.constant 0 : index
    %5 = vector.load %arg3[%c0_2, %c0_3, %c0_4] : memref<1x32x32xbf16, #tpu.memory_space<vmem>>, vector<1x32x32xbf16>
    %6 = vector.shape_cast %5 : vector<1x32x32xbf16> to vector<32x32xbf16>
    %cst = arith.constant dense<0.000000e+00> : vector<16x32xf32>
    %7 = tpu.matmul %4, %6, %cst {dimension_numbers = #tpu.dot_dimension_numbers<[1], [0], [0], [1], [0, 0, 1, 1], [], []>} : vector<16x32xbf16>, vector<32x32xbf16>, vector<16x32xf32> -> vector<16x32xf32>
    %c0_5 = arith.constant 0 : index
    %c0_6 = arith.constant 0 : index
    %c0_7 = arith.constant 0 : index
    %8 = vector.load %arg6[%c0_5, %c0_6, %c0_7] : memref<1x1x32xf32, #tpu.memory_space<vmem>>, vector<1x1x32xf32>
    %9 = vector.shape_cast %8 : vector<1x1x32xf32> to vector<1x32xf32>
    %10 = vector.broadcast %9 : vector<1x32xf32> to vector<16x32xf32>
    %11 = arith.addf %7, %10 : vector<16x32xf32>
    %c0_8 = arith.constant 0 : index
    %c0_9 = arith.constant 0 : index
    %c0_10 = arith.constant 0 : index
    %12 = vector.load %arg4[%c0_8, %c0_9, %c0_10] : memref<1x32x32xbf16, #tpu.memory_space<vmem>>, vector<1x32x32xbf16>
    %13 = vector.shape_cast %12 : vector<1x32x32xbf16> to vector<32x32xbf16>
    %cst_11 = arith.constant dense<0.000000e+00> : vector<16x32xf32>
    %14 = tpu.matmul %4, %13, %cst_11 {dimension_numbers = #tpu.dot_dimension_numbers<[1], [0], [0], [1], [0, 0, 1, 1], [], []>} : vector<16x32xbf16>, vector<32x32xbf16>, vector<16x32xf32> -> vector<16x32xf32>
    %c0_12 = arith.constant 0 : index
    %c0_13 = arith.constant 0 : index
    %c0_14 = arith.constant 0 : index
    %15 = vector.load %arg7[%c0_12, %c0_13, %c0_14] : memref<1x1x32xf32, #tpu.memory_space<vmem>>, vector<1x1x32xf32>
    %16 = vector.shape_cast %15 : vector<1x1x32xf32> to vector<1x32xf32>
    %17 = vector.broadcast %16 : vector<1x32xf32> to vector<16x32xf32>
    %18 = arith.addf %14, %17 : vector<16x32xf32>
    %c0_15 = arith.constant 0 : index
    %c0_16 = arith.constant 0 : index
    %c0_17 = arith.constant 0 : index
    %19 = vector.load %arg5[%c0_15, %c0_16, %c0_17] : memref<1x32x32xbf16, #tpu.memory_space<vmem>>, vector<1x32x32xbf16>
    %20 = vector.shape_cast %19 : vector<1x32x32xbf16> to vector<32x32xbf16>
    %cst_18 = arith.constant dense<0.000000e+00> : vector<16x32xf32>
    %21 = tpu.matmul %4, %20, %cst_18 {dimension_numbers = #tpu.dot_dimension_numbers<[1], [0], [0], [1], [0, 0, 1, 1], [], []>} : vector<16x32xbf16>, vector<32x32xbf16>, vector<16x32xf32> -> vector<16x32xf32>
    %c0_19 = arith.constant 0 : index
    %c0_20 = arith.constant 0 : index
    %c0_21 = arith.constant 0 : index
    %22 = vector.load %arg8[%c0_19, %c0_20, %c0_21] : memref<1x1x32xf32, #tpu.memory_space<vmem>>, vector<1x1x32xf32>
    %23 = vector.shape_cast %22 : vector<1x1x32xf32> to vector<1x32xf32>
    %24 = vector.broadcast %23 : vector<1x32xf32> to vector<16x32xf32>
    %25 = arith.addf %21, %24 : vector<16x32xf32>
    %cst_22 = arith.constant 0.000000e+00 : f32
    %26 = vector.broadcast %cst_22 : f32 to vector<2x8x8xf32>
    %27 = vector.extract_strided_slice %11 {offsets = [0, 0], sizes = [16, 8], strides = [1, 1]} : vector<16x32xf32> to vector<16x8xf32>
    %28 = vector.shape_cast %27 : vector<16x8xf32> to vector<2x8x8xf32>
    %29 = arith.truncf %28 : vector<2x8x8xf32> to vector<2x8x8xbf16>
    %30 = vector.extract_strided_slice %18 {offsets = [0, 0], sizes = [16, 8], strides = [1, 1]} : vector<16x32xf32> to vector<16x8xf32>
    %31 = vector.shape_cast %30 : vector<16x8xf32> to vector<2x8x8xf32>
    %32 = arith.truncf %31 : vector<2x8x8xf32> to vector<2x8x8xbf16>
    %33 = vector.extract_strided_slice %25 {offsets = [0, 0], sizes = [16, 8], strides = [1, 1]} : vector<16x32xf32> to vector<16x8xf32>
    %34 = vector.shape_cast %33 : vector<16x8xf32> to vector<2x8x8xf32>
    %35 = arith.truncf %34 : vector<2x8x8xf32> to vector<2x8x8xbf16>
    "tpu.trace_start"() <{level = 10 : i32, message = "bqd,bkd->bqk"}> : () -> ()
    %cst_23 = arith.constant dense<0.000000e+00> : vector<2x8x8xf32>
    %36 = tpu.matmul %29, %32, %cst_23 {dimension_numbers = #tpu.dot_dimension_numbers<[2], [2], [1], [1], [0, 0, 0, 1, 1, 1], [0], [0]>} : vector<2x8x8xbf16>, vector<2x8x8xbf16>, vector<2x8x8xf32> -> vector<2x8x8xf32>
    "tpu.trace_stop"() : () -> ()
    %cst_24 = arith.constant dense<0xFF800000> : vector<2x8xf32>
    %37 = vector.multi_reduction <maximumf>, %36, %cst_24 [2] : vector<2x8x8xf32> to vector<2x8xf32>
    %38 = vector.shape_cast %37 : vector<2x8xf32> to vector<2x8x1xf32>
    %39 = vector.broadcast %38 : vector<2x8x1xf32> to vector<2x8x8xf32>
    %40 = arith.subf %36, %39 : vector<2x8x8xf32>
    %41 = math.exp %40 : vector<2x8x8xf32>
    %cst_25 = arith.constant dense<0.000000e+00> : vector<2x8xf32>
    %42 = vector.multi_reduction <add>, %41, %cst_25 [2] : vector<2x8x8xf32> to vector<2x8xf32>
    %43 = vector.shape_cast %42 : vector<2x8xf32> to vector<2x8x1xf32>
    %44 = tpu.reciprocal %43 {approx = true} : vector<2x8x1xf32> -> vector<2x8x1xf32>
    %45 = vector.broadcast %44 : vector<2x8x1xf32> to vector<2x8x8xf32>
    %46 = arith.mulf %41, %45 : vector<2x8x8xf32>
    %47 = arith.addf %26, %46 : vector<2x8x8xf32>
    %48 = arith.truncf %46 : vector<2x8x8xf32> to vector<2x8x8xbf16>
    "tpu.trace_start"() <{level = 10 : i32, message = "bqk,bkd->bqd"}> : () -> ()
    %cst_26 = arith.constant dense<0.000000e+00> : vector<2x8x8xf32>
    %49 = tpu.matmul %48, %35, %cst_26 {dimension_numbers = #tpu.dot_dimension_numbers<[2], [1], [1], [2], [0, 0, 0, 1, 1, 2], [0], [0]>} : vector<2x8x8xbf16>, vector<2x8x8xbf16>, vector<2x8x8xf32> -> vector<2x8x8xf32>
    "tpu.trace_stop"() : () -> ()
    %50 = vector.shape_cast %49 : vector<2x8x8xf32> to vector<16x8xf32>
    %c0_27 = arith.constant 0 : index
    %c0_28 = arith.constant 0 : index
    %51 = vector.load %arg22[%c0_27, %c0_28] : memref<16x32xf32, #tpu.memory_space<vmem>>, vector<16x8xf32>
    tpu.vector_store %arg22[%c0_27, %c0_28], %50 {strides = array<i32>} : memref<16x32xf32, #tpu.memory_space<vmem>>, vector<16x8xf32>,
    %52 = vector.extract_strided_slice %11 {offsets = [0, 8], sizes = [16, 8], strides = [1, 1]} : vector<16x32xf32> to vector<16x8xf32>
    %53 = vector.shape_cast %52 : vector<16x8xf32> to vector<2x8x8xf32>
    %54 = arith.truncf %53 : vector<2x8x8xf32> to vector<2x8x8xbf16>
    %55 = vector.extract_strided_slice %18 {offsets = [0, 8], sizes = [16, 8], strides = [1, 1]} : vector<16x32xf32> to vector<16x8xf32>
    %56 = vector.shape_cast %55 : vector<16x8xf32> to vector<2x8x8xf32>
    %57 = arith.truncf %56 : vector<2x8x8xf32> to vector<2x8x8xbf16>
    %58 = vector.extract_strided_slice %25 {offsets = [0, 8], sizes = [16, 8], strides = [1, 1]} : vector<16x32xf32> to vector<16x8xf32>
    %59 = vector.shape_cast %58 : vector<16x8xf32> to vector<2x8x8xf32>
    %60 = arith.truncf %59 : vector<2x8x8xf32> to vector<2x8x8xbf16>
    "tpu.trace_start"() <{level = 10 : i32, message = "bqd,bkd->bqk"}> : () -> ()
    %cst_29 = arith.constant dense<0.000000e+00> : vector<2x8x8xf32>
    %61 = tpu.matmul %54, %57, %cst_29 {dimension_numbers = #tpu.dot_dimension_numbers<[2], [2], [1], [1], [0, 0, 0, 1, 1, 1], [0], [0]>} : vector<2x8x8xbf16>, vector<2x8x8xbf16>, vector<2x8x8xf32> -> vector<2x8x8xf32>
    "tpu.trace_stop"() : () -> ()
    %cst_30 = arith.constant dense<0xFF800000> : vector<2x8xf32>
    %62 = vector.multi_reduction <maximumf>, %61, %cst_30 [2] : vector<2x8x8xf32> to vector<2x8xf32>
    %63 = vector.shape_cast %62 : vector<2x8xf32> to vector<2x8x1xf32>
    %64 = vector.broadcast %63 : vector<2x8x1xf32> to vector<2x8x8xf32>
    %65 = arith.subf %61, %64 : vector<2x8x8xf32>
    %66 = math.exp %65 : vector<2x8x8xf32>
    %cst_31 = arith.constant dense<0.000000e+00> : vector<2x8xf32>
    %67 = vector.multi_reduction <add>, %66, %cst_31 [2] : vector<2x8x8xf32> to vector<2x8xf32>
    %68 = vector.shape_cast %67 : vector<2x8xf32> to vector<2x8x1xf32>
    %69 = tpu.reciprocal %68 {approx = true} : vector<2x8x1xf32> -> vector<2x8x1xf32>
    %70 = vector.broadcast %69 : vector<2x8x1xf32> to vector<2x8x8xf32>
    %71 = arith.mulf %66, %70 : vector<2x8x8xf32>
    %72 = arith.addf %47, %71 : vector<2x8x8xf32>
    %73 = arith.truncf %71 : vector<2x8x8xf32> to vector<2x8x8xbf16>
    "tpu.trace_start"() <{level = 10 : i32, message = "bqk,bkd->bqd"}> : () -> ()
    %cst_32 = arith.constant dense<0.000000e+00> : vector<2x8x8xf32>
    %74 = tpu.matmul %73, %60, %cst_32 {dimension_numbers = #tpu.dot_dimension_numbers<[2], [1], [1], [2], [0, 0, 0, 1, 1, 2], [0], [0]>} : vector<2x8x8xbf16>, vector<2x8x8xbf16>, vector<2x8x8xf32> -> vector<2x8x8xf32>
    "tpu.trace_stop"() : () -> ()
    %75 = vector.shape_cast %74 : vector<2x8x8xf32> to vector<16x8xf32>
    %c0_33 = arith.constant 0 : index
    %c8 = arith.constant 8 : index
    %76 = vector.load %arg22[%c0_33, %c8] : memref<16x32xf32, #tpu.memory_space<vmem>>, vector<16x8xf32>
    tpu.vector_store %arg22[%c0_33, %c8], %75 {strides = array<i32>} : memref<16x32xf32, #tpu.memory_space<vmem>>, vector<16x8xf32>,
    %77 = vector.extract_strided_slice %11 {offsets = [0, 16], sizes = [16, 8], strides = [1, 1]} : vector<16x32xf32> to vector<16x8xf32>
    %78 = vector.shape_cast %77 : vector<16x8xf32> to vector<2x8x8xf32>
    %79 = arith.truncf %78 : vector<2x8x8xf32> to vector<2x8x8xbf16>
    %80 = vector.extract_strided_slice %18 {offsets = [0, 16], sizes = [16, 8], strides = [1, 1]} : vector<16x32xf32> to vector<16x8xf32>
    %81 = vector.shape_cast %80 : vector<16x8xf32> to vector<2x8x8xf32>
    %82 = arith.truncf %81 : vector<2x8x8xf32> to vector<2x8x8xbf16>
    %83 = vector.extract_strided_slice %25 {offsets = [0, 16], sizes = [16, 8], strides = [1, 1]} : vector<16x32xf32> to vector<16x8xf32>
    %84 = vector.shape_cast %83 : vector<16x8xf32> to vector<2x8x8xf32>
    %85 = arith.truncf %84 : vector<2x8x8xf32> to vector<2x8x8xbf16>
    "tpu.trace_start"() <{level = 10 : i32, message = "bqd,bkd->bqk"}> : () -> ()
    %cst_34 = arith.constant dense<0.000000e+00> : vector<2x8x8xf32>
    %86 = tpu.matmul %79, %82, %cst_34 {dimension_numbers = #tpu.dot_dimension_numbers<[2], [2], [1], [1], [0, 0, 0, 1, 1, 1], [0], [0]>} : vector<2x8x8xbf16>, vector<2x8x8xbf16>, vector<2x8x8xf32> -> vector<2x8x8xf32>
    "tpu.trace_stop"() : () -> ()
    %cst_35 = arith.constant dense<0xFF800000> : vector<2x8xf32>
    %87 = vector.multi_reduction <maximumf>, %86, %cst_35 [2] : vector<2x8x8xf32> to vector<2x8xf32>
    %88 = vector.shape_cast %87 : vector<2x8xf32> to vector<2x8x1xf32>
    %89 = vector.broadcast %88 : vector<2x8x1xf32> to vector<2x8x8xf32>
    %90 = arith.subf %86, %89 : vector<2x8x8xf32>
    %91 = math.exp %90 : vector<2x8x8xf32>
    %cst_36 = arith.constant dense<0.000000e+00> : vector<2x8xf32>
    %92 = vector.multi_reduction <add>, %91, %cst_36 [2] : vector<2x8x8xf32> to vector<2x8xf32>
    %93 = vector.shape_cast %92 : vector<2x8xf32> to vector<2x8x1xf32>
    %94 = tpu.reciprocal %93 {approx = true} : vector<2x8x1xf32> -> vector<2x8x1xf32>
    %95 = vector.broadcast %94 : vector<2x8x1xf32> to vector<2x8x8xf32>
    %96 = arith.mulf %91, %95 : vector<2x8x8xf32>
    %97 = arith.addf %72, %96 : vector<2x8x8xf32>
    %98 = arith.truncf %96 : vector<2x8x8xf32> to vector<2x8x8xbf16>
    "tpu.trace_start"() <{level = 10 : i32, message = "bqk,bkd->bqd"}> : () -> ()
    %cst_37 = arith.constant dense<0.000000e+00> : vector<2x8x8xf32>
    %99 = tpu.matmul %98, %85, %cst_37 {dimension_numbers = #tpu.dot_dimension_numbers<[2], [1], [1], [2], [0, 0, 0, 1, 1, 2], [0], [0]>} : vector<2x8x8xbf16>, vector<2x8x8xbf16>, vector<2x8x8xf32> -> vector<2x8x8xf32>
    "tpu.trace_stop"() : () -> ()
    %100 = vector.shape_cast %99 : vector<2x8x8xf32> to vector<16x8xf32>
    %c0_38 = arith.constant 0 : index
    %c16 = arith.constant 16 : index
    %101 = vector.load %arg22[%c0_38, %c16] : memref<16x32xf32, #tpu.memory_space<vmem>>, vector<16x8xf32>
    tpu.vector_store %arg22[%c0_38, %c16], %100 {strides = array<i32>} : memref<16x32xf32, #tpu.memory_space<vmem>>, vector<16x8xf32>,
    %102 = vector.extract_strided_slice %11 {offsets = [0, 24], sizes = [16, 8], strides = [1, 1]} : vector<16x32xf32> to vector<16x8xf32>
    %103 = vector.shape_cast %102 : vector<16x8xf32> to vector<2x8x8xf32>
    %104 = arith.truncf %103 : vector<2x8x8xf32> to vector<2x8x8xbf16>
    %105 = vector.extract_strided_slice %18 {offsets = [0, 24], sizes = [16, 8], strides = [1, 1]} : vector<16x32xf32> to vector<16x8xf32>
    %106 = vector.shape_cast %105 : vector<16x8xf32> to vector<2x8x8xf32>
    %107 = arith.truncf %106 : vector<2x8x8xf32> to vector<2x8x8xbf16>
    %108 = vector.extract_strided_slice %25 {offsets = [0, 24], sizes = [16, 8], strides = [1, 1]} : vector<16x32xf32> to vector<16x8xf32>
    %109 = vector.shape_cast %108 : vector<16x8xf32> to vector<2x8x8xf32>
    %110 = arith.truncf %109 : vector<2x8x8xf32> to vector<2x8x8xbf16>
    "tpu.trace_start"() <{level = 10 : i32, message = "bqd,bkd->bqk"}> : () -> ()
    %cst_39 = arith.constant dense<0.000000e+00> : vector<2x8x8xf32>
    %111 = tpu.matmul %104, %107, %cst_39 {dimension_numbers = #tpu.dot_dimension_numbers<[2], [2], [1], [1], [0, 0, 0, 1, 1, 1], [0], [0]>} : vector<2x8x8xbf16>, vector<2x8x8xbf16>, vector<2x8x8xf32> -> vector<2x8x8xf32>
    "tpu.trace_stop"() : () -> ()
    %cst_40 = arith.constant dense<0xFF800000> : vector<2x8xf32>
    %112 = vector.multi_reduction <maximumf>, %111, %cst_40 [2] : vector<2x8x8xf32> to vector<2x8xf32>
    %113 = vector.shape_cast %112 : vector<2x8xf32> to vector<2x8x1xf32>
    %114 = vector.broadcast %113 : vector<2x8x1xf32> to vector<2x8x8xf32>
    %115 = arith.subf %111, %114 : vector<2x8x8xf32>
    %116 = math.exp %115 : vector<2x8x8xf32>
    %cst_41 = arith.constant dense<0.000000e+00> : vector<2x8xf32>
    %117 = vector.multi_reduction <add>, %116, %cst_41 [2] : vector<2x8x8xf32> to vector<2x8xf32>
    %118 = vector.shape_cast %117 : vector<2x8xf32> to vector<2x8x1xf32>
    %119 = tpu.reciprocal %118 {approx = true} : vector<2x8x1xf32> -> vector<2x8x1xf32>
    %120 = vector.broadcast %119 : vector<2x8x1xf32> to vector<2x8x8xf32>
    %121 = arith.mulf %116, %120 : vector<2x8x8xf32>
    %122 = arith.addf %97, %121 : vector<2x8x8xf32>
    %123 = arith.truncf %121 : vector<2x8x8xf32> to vector<2x8x8xbf16>
    "tpu.trace_start"() <{level = 10 : i32, message = "bqk,bkd->bqd"}> : () -> ()
    %cst_42 = arith.constant dense<0.000000e+00> : vector<2x8x8xf32>
    %124 = tpu.matmul %123, %110, %cst_42 {dimension_numbers = #tpu.dot_dimension_numbers<[2], [1], [1], [2], [0, 0, 0, 1, 1, 2], [0], [0]>} : vector<2x8x8xbf16>, vector<2x8x8xbf16>, vector<2x8x8xf32> -> vector<2x8x8xf32>
    "tpu.trace_stop"() : () -> ()
    %125 = vector.shape_cast %124 : vector<2x8x8xf32> to vector<16x8xf32>
    %c0_43 = arith.constant 0 : index
    %c24 = arith.constant 24 : index
    %126 = vector.load %arg22[%c0_43, %c24] : memref<16x32xf32, #tpu.memory_space<vmem>>, vector<16x8xf32>
    tpu.vector_store %arg22[%c0_43, %c24], %125 {strides = array<i32>} : memref<16x32xf32, #tpu.memory_space<vmem>>, vector<16x8xf32>,
    %c0_44 = arith.constant 0 : index
    %c0_45 = arith.constant 0 : index
    %127 = vector.load %arg22[%c0_44, %c0_45] : memref<16x32xf32, #tpu.memory_space<vmem>>, vector<16x32xf32>
    %128 = arith.truncf %127 : vector<16x32xf32> to vector<16x32xbf16>
    %c0_46 = arith.constant 0 : index
    %c0_47 = arith.constant 0 : index
    %c0_48 = arith.constant 0 : index
    %129 = vector.load %arg9[%c0_46, %c0_47, %c0_48] : memref<1x32x32xbf16, #tpu.memory_space<vmem>>, vector<1x32x32xbf16>
    %130 = vector.shape_cast %129 : vector<1x32x32xbf16> to vector<32x32xbf16>
    %cst_49 = arith.constant dense<0.000000e+00> : vector<16x32xf32>
    %131 = tpu.matmul %128, %130, %cst_49 {dimension_numbers = #tpu.dot_dimension_numbers<[1], [0], [0], [1], [0, 0, 1, 1], [], []>} : vector<16x32xbf16>, vector<32x32xbf16>, vector<16x32xf32> -> vector<16x32xf32>
    %c0_50 = arith.constant 0 : index
    %c0_51 = arith.constant 0 : index
    %c0_52 = arith.constant 0 : index
    %132 = vector.load %arg10[%c0_50, %c0_51, %c0_52] : memref<1x1x32xf32, #tpu.memory_space<vmem>>, vector<1x1x32xf32>
    %133 = vector.shape_cast %132 : vector<1x1x32xf32> to vector<1x32xf32>
    %134 = vector.broadcast %133 : vector<1x32xf32> to vector<16x32xf32>
    %135 = arith.addf %131, %134 : vector<16x32xf32>
    %136 = arith.addf %3, %135 : vector<16x32xf32>
    %c0_53 = arith.constant 0 : index
    %c0_54 = arith.constant 0 : index
    %c0_55 = arith.constant 0 : index
    %137 = vector.load %arg15[%c0_53, %c0_54, %c0_55] : memref<1x1x32xf32, #tpu.memory_space<vmem>>, vector<1x1x32xf32>
    %138 = vector.shape_cast %137 : vector<1x1x32xf32> to vector<1x32xf32>
    %c0_56 = arith.constant 0 : index
    %c0_57 = arith.constant 0 : index
    %c0_58 = arith.constant 0 : index
    %139 = vector.load %arg16[%c0_56, %c0_57, %c0_58] : memref<1x1x32xf32, #tpu.memory_space<vmem>>, vector<1x1x32xf32>
    %140 = vector.shape_cast %139 : vector<1x1x32xf32> to vector<1x32xf32>
    %cst_59 = arith.constant dense<0.000000e+00> : vector<16xf32>
    %141 = vector.multi_reduction <add>, %136, %cst_59 [1] : vector<16x32xf32> to vector<16xf32>
    %142 = vector.shape_cast %141 : vector<16xf32> to vector<16x1xf32>
    %cst_60 = arith.constant 3.200000e+01 : f32
    %143 = vector.broadcast %cst_60 : f32 to vector<16x1xf32>
    %144 = arith.divf %142, %143 : vector<16x1xf32>
    %145 = vector.broadcast %144 : vector<16x1xf32> to vector<16x32xf32>
    %146 = arith.subf %136, %145 : vector<16x32xf32>
    %147 = arith.mulf %146, %146 : vector<16x32xf32>
    %cst_61 = arith.constant dense<0.000000e+00> : vector<16xf32>
    %148 = vector.multi_reduction <add>, %147, %cst_61 [1] : vector<16x32xf32> to vector<16xf32>
    %149 = vector.shape_cast %148 : vector<16xf32> to vector<16x1xf32>
    %cst_62 = arith.constant 3.200000e+01 : f32
    %150 = vector.broadcast %cst_62 : f32 to vector<16x1xf32>
    %151 = arith.divf %149, %150 : vector<16x1xf32>
    %152 = vector.broadcast %144 : vector<16x1xf32> to vector<16x32xf32>
    %153 = arith.subf %136, %152 : vector<16x32xf32>
    %cst_63 = arith.constant 9.99999974E-6 : f32
    %154 = vector.broadcast %cst_63 : f32 to vector<16x1xf32>
    %155 = arith.addf %151, %154 : vector<16x1xf32>
    %156 = math.rsqrt %155 : vector<16x1xf32>
    %157 = vector.broadcast %156 : vector<16x1xf32> to vector<16x32xf32>
    %158 = arith.mulf %153, %157 : vector<16x32xf32>
    %159 = vector.broadcast %138 : vector<1x32xf32> to vector<16x32xf32>
    %160 = arith.mulf %158, %159 : vector<16x32xf32>
    %161 = vector.broadcast %140 : vector<1x32xf32> to vector<16x32xf32>
    %162 = arith.addf %160, %161 : vector<16x32xf32>
    %163 = arith.truncf %162 : vector<16x32xf32> to vector<16x32xbf16>
    %c0_64 = arith.constant 0 : index
    %c0_65 = arith.constant 0 : index
    %c0_66 = arith.constant 0 : index
    %164 = vector.load %arg11[%c0_64, %c0_65, %c0_66] : memref<1x32x64xbf16, #tpu.memory_space<vmem>>, vector<1x32x64xbf16>
    %165 = vector.shape_cast %164 : vector<1x32x64xbf16> to vector<32x64xbf16>
    %cst_67 = arith.constant dense<0.000000e+00> : vector<16x64xf32>
    %166 = tpu.matmul %163, %165, %cst_67 {dimension_numbers = #tpu.dot_dimension_numbers<[1], [0], [0], [1], [0, 0, 1, 1], [], []>} : vector<16x32xbf16>, vector<32x64xbf16>, vector<16x64xf32> -> vector<16x64xf32>
    %c0_68 = arith.constant 0 : index
    %c0_69 = arith.constant 0 : index
    %c0_70 = arith.constant 0 : index
    %167 = vector.load %arg12[%c0_68, %c0_69, %c0_70] : memref<1x1x64xf32, #tpu.memory_space<vmem>>, vector<1x1x64xf32>
    %168 = vector.shape_cast %167 : vector<1x1x64xf32> to vector<1x64xf32>
    %169 = vector.broadcast %168 : vector<1x64xf32> to vector<16x64xf32>
    %170 = arith.addf %166, %169 : vector<16x64xf32>
    %cst_71 = arith.constant 0.000000e+00 : f32
    %171 = vector.broadcast %cst_71 : f32 to vector<16x64xf32>
    %172 = arith.maximumf %170, %171 : vector<16x64xf32>
    %173 = arith.truncf %172 : vector<16x64xf32> to vector<16x64xbf16>
    %c0_72 = arith.constant 0 : index
    %c0_73 = arith.constant 0 : index
    %c0_74 = arith.constant 0 : index
    %174 = vector.load %arg13[%c0_72, %c0_73, %c0_74] : memref<1x64x32xbf16, #tpu.memory_space<vmem>>, vector<1x64x32xbf16>
    %175 = vector.shape_cast %174 : vector<1x64x32xbf16> to vector<64x32xbf16>
    %cst_75 = arith.constant dense<0.000000e+00> : vector<16x32xf32>
    %176 = tpu.matmul %173, %175, %cst_75 {dimension_numbers = #tpu.dot_dimension_numbers<[1], [0], [0], [1], [0, 0, 1, 1], [], []>} : vector<16x64xbf16>, vector<64x32xbf16>, vector<16x32xf32> -> vector<16x32xf32>
    %c0_76 = arith.constant 0 : index
    %c0_77 = arith.constant 0 : index
    %c0_78 = arith.constant 0 : index
    %177 = vector.load %arg14[%c0_76, %c0_77, %c0_78] : memref<1x1x32xf32, #tpu.memory_space<vmem>>, vector<1x1x32xf32>
    %178 = vector.shape_cast %177 : vector<1x1x32xf32> to vector<1x32xf32>
    %179 = vector.broadcast %178 : vector<1x32xf32> to vector<16x32xf32>
    %180 = arith.addf %176, %179 : vector<16x32xf32>
    %181 = arith.addf %162, %180 : vector<16x32xf32>
    %c0_79 = arith.constant 0 : index
    %c0_80 = arith.constant 0 : index
    %c0_81 = arith.constant 0 : index
    %182 = vector.load %arg17[%c0_79, %c0_80, %c0_81] : memref<1x1x32xf32, #tpu.memory_space<vmem>>, vector<1x1x32xf32>
    %183 = vector.shape_cast %182 : vector<1x1x32xf32> to vector<1x32xf32>
    %c0_82 = arith.constant 0 : index
    %c0_83 = arith.constant 0 : index
    %c0_84 = arith.constant 0 : index
    %184 = vector.load %arg18[%c0_82, %c0_83, %c0_84] : memref<1x1x32xf32, #tpu.memory_space<vmem>>, vector<1x1x32xf32>
    %185 = vector.shape_cast %184 : vector<1x1x32xf32> to vector<1x32xf32>
    %cst_85 = arith.constant dense<0.000000e+00> : vector<16xf32>
    %186 = vector.multi_reduction <add>, %181, %cst_85 [1] : vector<16x32xf32> to vector<16xf32>
    %187 = vector.shape_cast %186 : vector<16xf32> to vector<16x1xf32>
    %cst_86 = arith.constant 3.200000e+01 : f32
    %188 = vector.broadcast %cst_86 : f32 to vector<16x1xf32>
    %189 = arith.divf %187, %188 : vector<16x1xf32>
    %190 = vector.broadcast %189 : vector<16x1xf32> to vector<16x32xf32>
    %191 = arith.subf %181, %190 : vector<16x32xf32>
    %192 = arith.mulf %191, %191 : vector<16x32xf32>
    %cst_87 = arith.constant dense<0.000000e+00> : vector<16xf32>
    %193 = vector.multi_reduction <add>, %192, %cst_87 [1] : vector<16x32xf32> to vector<16xf32>
    %194 = vector.shape_cast %193 : vector<16xf32> to vector<16x1xf32>
    %cst_88 = arith.constant 3.200000e+01 : f32
    %195 = vector.broadcast %cst_88 : f32 to vector<16x1xf32>
    %196 = arith.divf %194, %195 : vector<16x1xf32>
    %197 = vector.broadcast %189 : vector<16x1xf32> to vector<16x32xf32>
    %198 = arith.subf %181, %197 : vector<16x32xf32>
    %cst_89 = arith.constant 9.99999974E-6 : f32
    %199 = vector.broadcast %cst_89 : f32 to vector<16x1xf32>
    %200 = arith.addf %196, %199 : vector<16x1xf32>
    %201 = math.rsqrt %200 : vector<16x1xf32>
    %202 = vector.broadcast %201 : vector<16x1xf32> to vector<16x32xf32>
    %203 = arith.mulf %198, %202 : vector<16x32xf32>
    %204 = vector.broadcast %183 : vector<1x32xf32> to vector<16x32xf32>
    %205 = arith.mulf %203, %204 : vector<16x32xf32>
    %206 = vector.broadcast %185 : vector<1x32xf32> to vector<16x32xf32>
    %207 = arith.addf %205, %206 : vector<16x32xf32>
    %c0_90 = arith.constant 0 : index
    %c0_91 = arith.constant 0 : index
    %208 = vector.load %arg21[%c0_90, %c0_91] : memref<16x32xf32, #tpu.memory_space<vmem>>, vector<16x32xf32>
    tpu.vector_store %arg21[%c0_90, %c0_91], %207 {strides = array<i32>} : memref<16x32xf32, #tpu.memory_space<vmem>>, vector<16x32xf32>,
    %c1_i32 = arith.constant 1 : i32
    %209 = arith.cmpi eq, %arg1, %c1_i32 : i32
    %210 = arith.extui %209 : i1 to i32
    %c0_i32_92 = arith.constant 0 : i32
    %211 = arith.cmpi ne, %210, %c0_i32_92 : i32
    scf.if %211 {
      %c0_93 = arith.constant 0 : index
      %c0_94 = arith.constant 0 : index
      %212 = vector.load %arg19[%c0_93, %c0_94] : memref<16x32xf32, #tpu.memory_space<vmem>>, vector<16x32xf32>
      tpu.vector_store %arg19[%c0_93, %c0_94], %207 {strides = array<i32>} : memref<16x32xf32, #tpu.memory_space<vmem>>, vector<16x32xf32>,
      %cst_95 = arith.constant 2.500000e-01 : f32
      %213 = vector.broadcast %cst_95 : f32 to vector<2x8x8xf32>
      %214 = arith.mulf %122, %213 : vector<2x8x8xf32>
      %c0_96 = arith.constant 0 : index
      %c0_97 = arith.constant 0 : index
      %c0_98 = arith.constant 0 : index
      %215 = vector.load %arg20[%c0_96, %c0_97, %c0_98] : memref<2x8x8xf32, #tpu.memory_space<vmem>>, vector<2x8x8xf32>
      tpu.vector_store %arg20[%c0_96, %c0_97, %c0_98], %214 {strides = array<i32>} : memref<2x8x8xf32, #tpu.memory_space<vmem>>, vector<2x8x8xf32>,
    } else {
    }
    return
  }
  func.func @transform_0(%arg0: i32, %arg1: i32) -> (i32, i32) {
    %c0_i32 = arith.constant 0 : i32
    %c0_i32_0 = arith.constant 0 : i32
    return %arg0, %c0_i32 : i32, i32
  }
  func.func @transform_1(%arg0: i32, %arg1: i32) -> (i32, i32, i32) {
    %c0_i32 = arith.constant 0 : i32
    %c0_i32_0 = arith.constant 0 : i32
    %c0_i32_1 = arith.constant 0 : i32
    return %arg1, %c0_i32, %c0_i32_0 : i32, i32, i32
  }
  func.func @transform_2(%arg0: i32, %arg1: i32) -> (i32, i32, i32) {
    %c0_i32 = arith.constant 0 : i32
    %c0_i32_0 = arith.constant 0 : i32
    %c0_i32_1 = arith.constant 0 : i32
    return %arg1, %c0_i32, %c0_i32_0 : i32, i32, i32
  }
  func.func @transform_3(%arg0: i32, %arg1: i32) -> (i32, i32, i32) {
    %c0_i32 = arith.constant 0 : i32
    %c0_i32_0 = arith.constant 0 : i32
    %c0_i32_1 = arith.constant 0 : i32
    return %arg1, %c0_i32, %c0_i32_0 : i32, i32, i32
  }
  func.func @transform_4(%arg0: i32, %arg1: i32) -> (i32, i32, i32) {
    %c0_i32 = arith.constant 0 : i32
    %c0_i32_0 = arith.constant 0 : i32
    %c0_i32_1 = arith.constant 0 : i32
    return %arg1, %c0_i32, %c0_i32_0 : i32, i32, i32
  }
  func.func @transform_5(%arg0: i32, %arg1: i32) -> (i32, i32, i32) {
    %c0_i32 = arith.constant 0 : i32
    %c0_i32_0 = arith.constant 0 : i32
    %c0_i32_1 = arith.constant 0 : i32
    return %arg1, %c0_i32, %c0_i32_0 : i32, i32, i32
  }
  func.func @transform_6(%arg0: i32, %arg1: i32) -> (i32, i32, i32) {
    %c0_i32 = arith.constant 0 : i32
    %c0_i32_0 = arith.constant 0 : i32
    %c0_i32_1 = arith.constant 0 : i32
    return %arg1, %c0_i32, %c0_i32_0 : i32, i32, i32
  }
  func.func @transform_7(%arg0: i32, %arg1: i32) -> (i32, i32, i32) {
    %c0_i32 = arith.constant 0 : i32
    %c0_i32_0 = arith.constant 0 : i32
    %c0_i32_1 = arith.constant 0 : i32
    return %arg1, %c0_i32, %c0_i32_0 : i32, i32, i32
  }
  func.func @transform_8(%arg0: i32, %arg1: i32) -> (i32, i32, i32) {
    %c0_i32 = arith.constant 0 : i32
    %c0_i32_0 = arith.constant 0 : i32
    %c0_i32_1 = arith.constant 0 : i32
    return %arg1, %c0_i32, %c0_i32_0 : i32, i32, i32
  }
  func.func @transform_9(%arg0: i32, %arg1: i32) -> (i32, i32, i32) {
    %c0_i32 = arith.constant 0 : i32
    %c0_i32_0 = arith.constant 0 : i32
    %c0_i32_1 = arith.constant 0 : i32
    return %arg1, %c0_i32, %c0_i32_0 : i32, i32, i32
  }
  func.func @transform_10(%arg0: i32, %arg1: i32) -> (i32, i32, i32) {
    %c0_i32 = arith.constant 0 : i32
    %c0_i32_0 = arith.constant 0 : i32
    %c0_i32_1 = arith.constant 0 : i32
    return %arg1, %c0_i32, %c0_i32_0 : i32, i32, i32
  }
  func.func @transform_11(%arg0: i32, %arg1: i32) -> (i32, i32, i32) {
    %c0_i32 = arith.constant 0 : i32
    %c0_i32_0 = arith.constant 0 : i32
    %c0_i32_1 = arith.constant 0 : i32
    return %arg1, %c0_i32, %c0_i32_0 : i32, i32, i32
  }
  func.func @transform_12(%arg0: i32, %arg1: i32) -> (i32, i32, i32) {
    %c0_i32 = arith.constant 0 : i32
    %c0_i32_0 = arith.constant 0 : i32
    %c0_i32_1 = arith.constant 0 : i32
    return %arg1, %c0_i32, %c0_i32_0 : i32, i32, i32
  }
  func.func @transform_13(%arg0: i32, %arg1: i32) -> (i32, i32, i32) {
    %c0_i32 = arith.constant 0 : i32
    %c0_i32_0 = arith.constant 0 : i32
    %c0_i32_1 = arith.constant 0 : i32
    return %arg1, %c0_i32, %c0_i32_0 : i32, i32, i32
  }
  func.func @transform_14(%arg0: i32, %arg1: i32) -> (i32, i32, i32) {
    %c0_i32 = arith.constant 0 : i32
    %c0_i32_0 = arith.constant 0 : i32
    %c0_i32_1 = arith.constant 0 : i32
    return %arg1, %c0_i32, %c0_i32_0 : i32, i32, i32
  }
  func.func @transform_15(%arg0: i32, %arg1: i32) -> (i32, i32, i32) {
    %c0_i32 = arith.constant 0 : i32
    %c0_i32_0 = arith.constant 0 : i32
    %c0_i32_1 = arith.constant 0 : i32
    return %arg1, %c0_i32, %c0_i32_0 : i32, i32, i32
  }
  func.func @transform_16(%arg0: i32, %arg1: i32) -> (i32, i32, i32) {
    %c0_i32 = arith.constant 0 : i32
    %c0_i32_0 = arith.constant 0 : i32
    %c0_i32_1 = arith.constant 0 : i32
    return %arg1, %c0_i32, %c0_i32_0 : i32, i32, i32
  }
  func.func @transform_17(%arg0: i32, %arg1: i32) -> (i32, i32) {
    %c0_i32 = arith.constant 0 : i32
    %c0_i32_0 = arith.constant 0 : i32
    return %arg0, %c0_i32 : i32, i32
  }
  func.func @transform_18(%arg0: i32, %arg1: i32) -> (i32, i32, i32) {
    %c0_i32 = arith.constant 0 : i32
    %c0_i32_0 = arith.constant 0 : i32
    %c0_i32_1 = arith.constant 0 : i32
    return %arg0, %c0_i32, %c0_i32_0 : i32, i32, i32
  }
}

</mosaic_0001>

<bundles_post_ra>
// kernel: tpu_custom_call.1
= control target key start
LH: loop header
LB: loop body
LE: loop exit
PB: predicated region body
PF: predicated region fallthrough
CT: control target
= control target key end

     0   :  { %s4112_s0 = inlined_call_operand.hbm [shape: f32[16,32], index: 0, kind: input, shape index: {}]   ;;  %s4113_s1 = inlined_call_operand.vmem [shape: bf16[2,32,32], index: 1, kind: input, shape index: {}]   ;;  %s4114_s2 = inlined_call_operand.vmem [shape: bf16[2,32,32], index: 2, kind: input, shape index: {}]   ;;  %s4115_s3 = inlined_call_operand.vmem [shape: bf16[2,32,32], index: 3, kind: input, shape index: {}]   ;;  %s4116_s4 = inlined_call_operand.vmem [shape: f32[2,1,32], index: 4, kind: input, shape index: {}]   ;;  %s4117_s5 = inlined_call_operand.vmem [shape: f32[2,1,32], index: 5, kind: input, shape index: {}]   ;;  %s4118_s6 = inlined_call_operand.vmem [shape: f32[2,1,32], index: 6, kind: input, shape index: {}]   ;;  %s4119_s7 = inlined_call_operand.hbm [shape: bf16[2,32,32], index: 7, kind: input, shape index: {}]   ;;  %s4120_s8 = inlined_call_operand.vmem [shape: f32[2,1,32], index: 8, kind: input, shape index: {}]   ;;  %s4121_s9 = inlined_call_operand.hbm [shape: bf16[2,32,64], index: 9, kind: input, shape index: {}]   ;;  %s4122_s10 = inlined_call_operand.hbm [shape: f32[2,1,64], index: 10, kind: input, shape index: {}]   ;;  %s4123_s11 = inlined_call_operand.vmem [shape: bf16[2,64,32], index: 11, kind: input, shape index: {}]   ;;  %s4124_s12 = inlined_call_operand.vmem [shape: f32[2,1,32], index: 12, kind: input, shape index: {}]   ;;  %s4125_s13 = inlined_call_operand.vmem [shape: f32[2,1,32], index: 13, kind: input, shape index: {}]   ;;  %s4126_s14 = inlined_call_operand.vmem [shape: f32[2,1,32], index: 14, kind: input, shape index: {}]   ;;  %s4127_s15 = inlined_call_operand.vmem [shape: f32[2,1,32], index: 15, kind: input, shape index: {}]   ;;  %s4128_s16 = inlined_call_operand.vmem [shape: f32[2,1,32], index: 16, kind: input, shape index: {}]   ;;  %s4129_s17 = inlined_call_operand.hbm [shape: f32[16,32], index: 17, kind: output, shape index: {0}]   ;;  %s4130_s18 = inlined_call_operand.hbm [shape: f32[2,8,8], index: 18, kind: output, shape index: {1}]  }
   0x1   :  { %4155 = sst [smem:[#allocation29_spill]] %s4112_s0 }
   0x2   :  { %4156 = sst [smem:[#allocation30_spill]] %s4113_s1 }
   0x3   :  { %4157 = sst [smem:[#allocation31_spill]] %s4114_s2 }
   0x4   :  { %4158 = sst [smem:[#allocation32_spill]] %s4115_s3 }
   0x5   :  { %4159 = sst [smem:[#allocation33_spill]] %s4119_s7 }
   0x6   :  { %4160 = sst [smem:[#allocation34_spill]] %s4120_s8 }
   0x7   :  { %4161 = sst [smem:[#allocation35_spill]] %s4121_s9 }
   0x8   :  { %4162 = sst [smem:[#allocation36_spill]] %s4122_s10 }
   0x9   :  { %4163 = sst [smem:[#allocation37_spill]] %s4123_s11 }
   0xa   :  { %4164 = sst [smem:[#allocation38_spill]] %s4124_s12 }
   0xb   :  { %4165 = sst [smem:[#allocation39_spill]] %s4125_s13 }
   0xc   :  { %4166 = sst [smem:[#allocation40_spill]] %s4126_s14 }
   0xd   :  { %4167 = sst [smem:[#allocation41_spill]] %s4127_s15 }
   0xe   :  { %4168 = sst [smem:[#allocation42_spill]] %s4128_s16 }
   0xf   :  { %4169 = sst [smem:[#allocation43_spill]] %s4129_s17 }
  0x10   :  { %4170 = sst [smem:[#allocation44_spill]] %s4130_s18 }
  0x11   :  { %24 = vsyncpa [#allocation5], 0 }
  0x12   :  { %25 = vsyncpa [#allocation8], 0 }
  0x13   :  { %27 = vsyncpa [#allocation8 + $0x1], 0 }
  0x14   :  { %28 = vsyncpa [#allocation11], 0 }
  0x15   :  { %30 = vsyncpa [#allocation11 + $0x1], 0 }
  0x16   :  { %31 = vsyncpa [#allocation6], 0 }
  0x17   :  { %32 = vsyncpa [#allocation14], 0  ;;  %s3447_s27 = smov 0   ;;  %s3449_s28 = smov 0  }
  0x18   :  { %s3451_s29 = smov 0   ;;  %s3453_s30 = smov 0  }
  0x19   :  { %s3455_s0 = smov 0   ;;  %s3457_s19 = smov 0  }
  0x1a LB: > { %4171 = sst [smem:[#allocation20_spill]] %s3315_s28  ;;  %s47_s1 = sadd.s32 1, %s3327_s0  ;;  %s3331_s19 = sphi %s3457_s19, %s38_s19   ;;  %s3327_s0 = sphi %s3455_s0, %s4232_s0   ;;  %s3323_s30 = sphi %s3453_s30, %s4231_s30   ;;  %s3319_s29 = sphi %s3451_s29, %s4230_s29   ;;  %s3315_s28 = sphi %s3449_s28, %s4229_s28   ;;  %s3311_s27 = sphi %s3447_s27, %s4228_s27  }
  0x1b   : > { %4172 = sst [smem:[#allocation21_spill]] %s3319_s29  ;;  %s239_s20 = sadd.s32 1, %s3319_s29 }
  0x1c   : > { %4173 = sst [smem:[#allocation22_spill]] %s3327_s0  ;;  %p48_p0 = scmp.ge.s32.totalorder %s47_s1, 2 }
  0x1d   : > { %4174 = sst [smem:[#allocation23_spill]] %s3331_s19  ;;  %p246_p1 = scmp.ne.s32.totalorder %s3319_s29, %s3315_s28 }
  0x1e   : > { %p247_p2 = scmp.eq.s32.totalorder %s3331_s19, 0  ;;  %s4234_s1 = smov (%p48_p0, %s47_s1), 0 }
  0x1f   : > { %4175 = sst [smem:[#allocation24_spill]] %s4234_s1  ;;  %p2971_p4 = scmp.lt.s32.totalorder %s3331_s19, 2 }
  0x20   : > { %p248_p3 = por %p247_p2, %p246_p1  ;;  %s236_s21 = ssub.s32 %s3327_s0, %s4234_s1 }
  0x21   : > { %s620_s22 = sand.u32 1, %s3331_s19   ;;  %p237_p5 = scmp.eq.s32.totalorder %s236_s21, 0 }
  0x22   : > { %s3489_s2 = sand.u32 1, %s3319_s29   ;;  %s4136_s23 = sshll.u32 %s3327_s0, 8 }
  0x23   : > { %s3493_s24 = scalar_select %p237_p5, %s3319_s29, %s239_s20  }
  0x24   : > { %s4137_s25 = sshll.u32 %s3489_s2, 4  ;;  %s4177_s7 = sld [smem:[#allocation33_spill]] }
  0x25   : > { %4176 = sst [smem:[#allocation25_spill]] %s3493_s24  ;;  %p3503_p6 = pnand %p2971_p4, %p248_p3 }
  0x26   : > { %s624_s1 = scalar_lea.vmem [#allocation7], %s4137_s25  ;;  %s3511_s24 = scalar_lea.sflag [#allocation8], %s620_s22 }
  0x27   : > { %s4178_s21 = scalar_select %p3503_p6, 1, 0 }
  0x28   : > { %s631_s20 = sshll.u32 %s624_s1, 4  ;;  %p3517_p8 = pneg %p3503_p6  ;;  %s3509_s20 = int_to_ptr.vmem [resolvable:$true] %s631_s20 }
  0x2a   : > { %s3501_s17 = scalar_lea.hbm %s4177_s7, %s4136_s23  ;;  %s3100_s25 = scalar_lea.hbm %s4177_s7, 512 }
  0x2b   : > { %s3095_s29 = scalar_lea.hbm %s3501_s17, 256  ;;  %p3101_p11 = scmp.lt.u32.totalorder %s3501_s17, %s4177_s7 }
  0x2c   : > { %p3096_p7 = scmp.ne.s32.totalorder %s3501_s17, %s3095_s29  ;;  %p3102_p12 = scmp.lt.u32.totalorder %s3100_s25, %s3095_s29 }
  0x2d   : > { %s4179_s18 = scalar_select %p3517_p8, 1, 0 }
  0x2e   : > { %p3098_p9 = pnand %p3517_p8, %p3096_p7  ;;  %p3103_p13 = por %p3102_p12, %p3101_p11 }
  0x2f   : > { %p3104_p0 = scmp.lt.u32.totalorder %s3095_s29, %s3501_s17 }
  0x30   : > { %p3099_p10 = pneg %p3098_p9 }
  0x31   : > { %p3105_p1 = por %p3104_p0, %p3103_p13 }
  0x33   : > { %p3106_p2 = pnand %p3105_p1, %p3099_p10 }
  0x35   : > { %3109 = shalt.err (!%p3106_p2)
}
  0x36   : > { %s3110_s22 = scalar_lea.vmem %s3509_s20, 256  ;;  %s3333_s23 = smov [#allocation7]  }
  0x37   : > { %p3111_p3 = scmp.ne.s32.totalorder %s3509_s20, %s3110_s22  ;;  %s3115_s26 = sshll.u32 %s3333_s23, 4  ;;  %s3116_s26 = int_to_ptr.vmem [resolvable:$false] %s3115_s26 }
  0x38   : > { %s3117_s16 = scalar_lea.vmem %s3116_s26, 512  ;;  %p3118_p7 = scmp.lt.s32.totalorder %s3509_s20, %s3116_s26 }
  0x39   : > { %p3113_p4 = pnand %p3111_p3, %p3517_p8  ;;  %p3119_p9 = scmp.lt.s32.totalorder %s3117_s16, %s3110_s22 }
  0x3b   : > { %p3114_p5 = pneg %p3113_p4  ;;  %p3120_p11 = por %p3119_p9, %p3118_p7 }
  0x3d   : > { %p3121_p12 = pnand %p3120_p11, %p3114_p5 }
  0x3f   : > { %3124 = shalt.err (!%p3121_p12)
}
  0x40   : > { %s4138_s29 = smov 64   ;;  %s4139_s25 = smov 4  }
  0x41   : > { %2963 = dma.hbm_to_vmem [thread:$0]  (!%p3503_p6), %s3501_s17, 256, %s3509_s20, %s3511_s24, %s4138_s29, %s4138_s29, %s4139_s25  }
  0x42   : > { %s4180_s1 = sshll.u32 %s3327_s0, 8  ;;  %s4181_s9 = sld [smem:[#allocation35_spill]] }
  0x43   : > { %s4182_s16 = sshll.u32 %s3489_s2, 4  ;;  %s3556_s14 = sadd.s32 4294967295, %s3331_s19  }
  0x44   : > { %s651_s7 = scalar_lea.vmem [#allocation9], %s4182_s16  ;;  %4183 = sst [smem:[#allocation26_spill]] %s3556_s14 }
  0x45   : > { %s658_s15 = sshll.u32 %s651_s7, 4  ;;  %p252_p10 = scmp.ne.s32.totalorder %s3315_s28, %s3311_s27  ;;  %s3553_s15 = int_to_ptr.vmem [resolvable:$true] %s658_s15 }
  0x46   : > { %p4140_p13 = scmp.eq.s32.totalorder %s3556_s14, 0  ;;  %p2656_p0 = scmp.ge.s32.totalorder %s3331_s19, 1 }
  0x47   : > { %p549_p1 = scmp.lt.s32.totalorder %s3331_s19, 3  ;;  %s3336_s20 = smov [#allocation4]  }
  0x48   : > { %s3549_s26 = scalar_lea.hbm %s4181_s9, %s4180_s1  ;;  %p3565_p2 = por %p4140_p13, %p252_p10 }
  0x49   : > { %p3569_p3 = pnand %p2656_p0, %p549_p1  ;;  %s564_s1 = sshll.u32 %s3336_s20, 4  ;;  %s3575_s1 = int_to_ptr.vmem [resolvable:$true] %s564_s1 }
  0x4a   : > { %s4184_s17 = scalar_select %p3565_p2, 1, 0 }
  0x4b   : > { %s4185_s7 = scalar_select %p3569_p3, 1, 0 }
  0x4c   : > { %p2956_p4 = pneg %p3569_p3  ;;  %s3125_s22 = scalar_lea.hbm %s3549_s26, 256 }
  0x4d   : > { %p3126_p7 = scmp.ne.s32.totalorder %s3549_s26, %s3125_s22  ;;  %s3130_s29 = scalar_lea.hbm %s4181_s9, 512 }
  0x4e   : > { %p3579_p5 = pnand %p2956_p4, %p4140_p13  ;;  %p3131_p12 = scmp.lt.u32.totalorder %s3549_s26, %s4181_s9 }
  0x4f   : > { %p3128_p9 = pnand %p3126_p7, %p3517_p8  ;;  %p3132_p10 = scmp.lt.u32.totalorder %s3130_s29, %s3125_s22 }
  0x50   : > { %s4186_s27 = scalar_select %p3579_p5, 1, 0 }
  0x51   : > { %p3129_p11 = pneg %p3128_p9  ;;  %p3133_p0 = por %p3132_p10, %p3131_p12 }
  0x52   : > { %p3134_p1 = scmp.lt.u32.totalorder %s3125_s22, %s3549_s26 }
  0x54   : > { %p3135_p4 = por %p3134_p1, %p3133_p0 }
  0x56   : > { %p3136_p13 = pnand %p3135_p4, %p3129_p11 }
  0x58   : > { %3139 = shalt.err (!%p3136_p13)
}
  0x59   : > { %s3140_s19 = scalar_lea.vmem %s3553_s15, 256  ;;  %s3337_s23 = smov [#allocation9]  }
  0x5a   : > { %p3141_p7 = scmp.ne.s32.totalorder %s3553_s15, %s3140_s19  ;;  %s3145_s16 = sshll.u32 %s3337_s23, 4  ;;  %s3146_s16 = int_to_ptr.vmem [resolvable:$false] %s3145_s16 }
  0x5b   : > { %s3147_s25 = scalar_lea.vmem %s3146_s16, 512  ;;  %p3148_p3 = scmp.lt.s32.totalorder %s3553_s15, %s3146_s16 }
  0x5c   : > { %p3143_p9 = pnand %p3141_p7, %p3517_p8  ;;  %p3149_p5 = scmp.lt.s32.totalorder %s3147_s25, %s3140_s19 }
  0x5e   : > { %p3144_p2 = pneg %p3143_p9  ;;  %p3150_p12 = por %p3149_p5, %p3148_p3 }
  0x60   : > { %p3151_p10 = pnand %p3150_p12, %p3144_p2 }
  0x62   : > { %3154 = shalt.err (!%p3151_p10)
}
  0x63   : > { %s4187_s29 = smov 4   ;;  %s4188_s22 = smov 64  }
  0x64   : > { %2966 = dma.hbm_to_vmem [thread:$0]  (!%p3503_p6), %s3549_s26, 256, %s3553_s15, %s3511_s24, %s4188_s22, %s4188_s22, %s4187_s29  }
  0x65   : > { %s2665_s20 = sshll.u32 %s3327_s0, 4  ;;  %s4189_s13 = sld [smem:[#allocation29_spill]] }
  0x66   : > { %p4190_p2 = scmp.ne.s32.totalorder %s4186_s27, 0 }
  0x68   : > { %p3157_p3 = pneg %p4190_p2 }
  0x6b   : > { %s3155_s16 = scalar_lea.hbm %s4189_s13, 256 }
  0x6c   : > { %p3156_p13 = scmp.ne.s32.totalorder %s4189_s13, %s3155_s16  ;;  %p3162_p0 = scmp.lt.u32.totalorder %s3155_s16, %s4189_s13 }
  0x6e   : > { %p3158_p5 = pnand %p3157_p3, %p3156_p13 }
  0x70   : > { %p3159_p11 = pneg %p3158_p5 }
  0x72   : > { %p3164_p1 = pnand %p3162_p0, %p3159_p11 }
  0x74   : > { %3167 = shalt.err (!%p3164_p1)
}
  0x75   : > { %s3168_s15 = scalar_lea.vmem %s3575_s1, 256  ;;  %p3176_p12 = scmp.lt.s32.totalorder %s3575_s1, %s3575_s1 }
  0x76   : > { %p3169_p4 = scmp.ne.s32.totalorder %s3575_s1, %s3168_s15  ;;  %p3177_p10 = scmp.lt.s32.totalorder %s3168_s15, %s3168_s15 }
  0x78   : > { %p3171_p7 = pnand %p3169_p4, %p3157_p3  ;;  %p3178_p6 = por %p3177_p10, %p3176_p12 }
  0x7a   : > { %p3172_p9 = pneg %p3171_p7 }
  0x7c   : > { %p3179_p8 = pnand %p3178_p6, %p3172_p9 }
  0x7e   : > { %3182 = shalt.err (!%p3179_p8)
}
  0x7f   : > { %s3338_s9 = smov 128   ;;  %s3339_s11 = smov 8  }
  0x80   : > { %2959 = dma.hbm_to_vmem [thread:$0]  (!%p4190_p2), %s4189_s13, 256, %s3575_s1, [#allocation5], %s3338_s9, %s3338_s9, %s3339_s11  }
  0x81   : > { %s4191_s10 = sld [smem:[#allocation36_spill]]  ;;  %s671_s23 = scalar_lea.vmem [#allocation10], %s3489_s2 }
  0x82   : > { %s678_s16 = sshll.u32 %s671_s23, 4  ;;  %s669_s19 = scalar_lea.sflag [#allocation11], %s3489_s2  ;;  %s679_s16 = int_to_ptr.vmem [resolvable:$true] %s678_s16 }
  0x83   : > { %p4192_p8 = scmp.ne.s32.totalorder %s4179_s18, 0 }
  0x87   : > { %s3633_s22 = scalar_lea.hbm %s4191_s10, %s2665_s20  ;;  %s3188_s15 = scalar_lea.hbm %s4191_s10, 32 }
  0x88   : > { %s3183_s25 = scalar_lea.hbm %s3633_s22, 16  ;;  %p3189_p2 = scmp.lt.u32.totalorder %s3633_s22, %s4191_s10 }
  0x89   : > { %p3184_p6 = scmp.ne.s32.totalorder %s3633_s22, %s3183_s25  ;;  %p3190_p5 = scmp.lt.u32.totalorder %s3188_s15, %s3183_s25 }
  0x8a   : > { %p3192_p0 = scmp.lt.u32.totalorder %s3183_s25, %s3633_s22 }
  0x8b   : > { %p3186_p13 = pnand %p3184_p6, %p4192_p8  ;;  %p3191_p11 = por %p3190_p5, %p3189_p2 }
  0x8d   : > { %p3187_p3 = pneg %p3186_p13  ;;  %p3193_p1 = por %p3192_p0, %p3191_p11 }
  0x8f   : > { %p3194_p4 = pnand %p3193_p1, %p3187_p3 }
  0x91   : > { %3197 = shalt.err (!%p3194_p4)
}
  0x92   : > { %s3198_s2 = scalar_lea.vmem %s679_s16, 16  ;;  %s3340_s11 = smov [#allocation10]  }
  0x93   : > { %p3199_p7 = scmp.ne.s32.totalorder %s679_s16, %s3198_s2  ;;  %s3203_s12 = sshll.u32 %s3340_s11, 4  ;;  %s3204_s12 = int_to_ptr.vmem [resolvable:$false] %s3203_s12 }
  0x94   : > { %s3205_s24 = scalar_lea.vmem %s3204_s12, 32  ;;  %p3206_p10 = scmp.lt.s32.totalorder %s679_s16, %s3204_s12 }
  0x95   : > { %p3201_p9 = pnand %p3199_p7, %p4192_p8  ;;  %p3207_p6 = scmp.lt.s32.totalorder %s3205_s24, %s3198_s2 }
  0x97   : > { %p3202_p12 = pneg %p3201_p9  ;;  %p3208_p13 = por %p3207_p6, %p3206_p10 }
  0x99   : > { %p3209_p2 = pnand %p3208_p13, %p3202_p12 }
  0x9b   : > { %3212 = shalt.err (!%p3209_p2)
}
  0x9c   : > { %p4193_p5 = scmp.ne.s32.totalorder %s4178_s21, 0  ;;  %p4194_p3 = scmp.ne.s32.totalorder %s4185_s7, 0 }
  0x9e   : > { %2969 = dma.hbm_to_vmem [thread:$0]  (!%p4193_p5), %s3633_s22, 16, %s679_s16, %s669_s19  }
  0x9f   : > { %725 = sbr.rel (%p4194_p3) target bundleno = 4259 (0x10a3), region = 88 }
  0xa6   : > { %p4195_p11 = scmp.eq.s32.totalorder %s3556_s14, 0 }
  0xa8   : > { %3290 = dma.done.wait (%p4195_p11), [#allocation5], 256   ;;  %p4196_p8 = pmov %p4195_p11 }
  0xa9   : > { %s731_s18 = sand.u32 1, %s3556_s14   ;;  %s3662_s26 = sand.u32 1, %s3315_s28  }
  0xaa   : > { %3292 = vsyncadd (%p4196_p8), [#allocation5], 4294967040  ;;  %4197 = sst [smem:[#allocation27_spill]] %s3662_s26  ;;  %s2668_s29 = sshll.u32 %s3662_s26, 4 }
  0xab   : > { %s732_s21 = scalar_lea.sflag [#allocation8], %s731_s18  ;;  %s3665_s23 = scalar_lea.vmem [#allocation7], %s2668_s29 }
  0xac   : > { %p4198_p0 = scmp.ne.s32.totalorder %s4184_s17, 0 }
  0xae   : > { %3294 = dma.done.wait (%p4198_p0), %s732_s21, 512  }
  0xaf   : > { %3296 = vsyncadd (%p4198_p0), %s732_s21, 4294966784  ;;  %s3671_s7 = scalar_lea.vmem [#allocation9], %s2668_s29  ;;  %s750_s22 = scalar_lea.sflag [#allocation11], %s3662_s26 }
  0xb0   : > { %4199 = sst [smem:[#allocation28_spill]] %s3671_s7 }
  0xb1   : > { %3298 = dma.done.wait (%p4198_p0), %s750_s22, 16  }
  0xb2   : > { %3300 = vsyncadd (%p4198_p0), %s750_s22, 4294967280  ;;  %p857_p1 = scmp.lt.s32.totalorder %s3323_s30, 1  ;;  %s4200_s20 = sld [smem:[#allocation30_spill]] }
  0xb3   : > { %s4201_s24 = sld [smem:[#allocation31_spill]]  ;;  %s4202_s3 = sld [smem:[#allocation32_spill]] }
  0xb4   : > { %s3681_s19 = scalar_select %p857_p1, %s3323_s30, 1 }
  0xb5   : > { %s4205_s21 = sld [smem:[#allocation37_spill]]  ;;  %s4206_s13 = sld [smem:[#allocation39_spill]] }
  0xb6   : > { %s2734_s25 = sshll.u32 %s3681_s19, 4  ;;  %s2737_s0 = sshll.u32 %s3681_s19, 5 }
  0xb7   : > { %s4207_s1 = sld [smem:[#allocation40_spill]]  ;;  %s4209_s12 = sld [smem:[#allocation42_spill]] }
  0xb8   : > { %s3691_s2 = scalar_lea.vmem %s4200_s20, %s2734_s25  ;;  %s4208_s20 = sld [smem:[#allocation41_spill]] }
  0xb9   : > { %s866_s18 = scalar_lea.vmem %s4201_s24, %s2734_s25  ;;  %s3699_s22 = scalar_lea.vmem %s4202_s3, %s2734_s25 }
  0xba   : > { %s4204_s24 = sld [smem:[#allocation38_spill]]  ;;  %p2678_p4 = scmp.ne.s32.totalorder %s3323_s30, 0 }
  0xbb   : > { %s3721_s3 = scalar_lea.vmem %s4205_s21, %s2737_s0  ;;  %s894_s14 = scalar_lea.vmem %s4206_s13, %s3681_s19  ;;  %v911_v0 = vld [vmem:[#allocation4] sm:$0xff] (!%p2678_p4)  ;;  %vm913_vm0 = vcmask (!%p2678_p4), 261120   ;;  %v912_v1 = vld [vmem:[#allocation4 + $0x8] sm:$0xff] (!%p2678_p4) }
  0xbc   : > { %910 = sbr.rel (%p2678_p4) target bundleno = 195 (0xc3), region = 108  ;;  %914 = vst.msk [vmem:[#allocation2] sm:$0xff] (!%p2678_p4), %vm913_vm0, %v911_v0  ;;  %915 = vst.msk [vmem:[#allocation2 + $0x8] sm:$0xff] (!%p2678_p4), %vm913_vm0, %v912_v1 }
  0xbd   : > { %s897_s26 = scalar_lea.vmem %s4207_s1, %s3681_s19 }
  0xbe   : > { %s900_s7 = scalar_lea.vmem %s4208_s20, %s3681_s19 }
  0xc0   : > { %s891_s28 = scalar_lea.vmem %s4204_s24, %s3681_s19  ;;  %s903_s24 = scalar_lea.vmem %s4209_s12, %s3681_s19 }
  0xc3 PF: > { %v3041_v2 = vld [vmem:[%s866_s18] sm:$0xff]   ;;  %v3341_v3 = vmov 0.0   ;;  %v3042_v4 = vld [vmem:[%s866_s18 + $0x8] sm:$0xff]   ;;  %vm3342_vm1 = vmmov 0   ;;  %vm942_vm2 = vcmask 261120   ;;  %s4210_s0 = scalar_lea.vmem %s4117_s5, %s3681_s19  ;;  %s4211_s18 = scalar_lea.vmem %s4116_s4, %s3681_s19  ;;  %vm1121_vm3 = vcmask 64512  }
  0xc4   : > { %2798 = vmatprep.subr.bf16.mxu1 %v3341_v3  ;;  %2790 = vmatprep.subr.bf16.mxu0 %v3341_v3  ;;  %v3043_v5 = vld [vmem:[%s3691_s2] sm:$0xff]   ;;  %v3748_v7 = vld [vmem:[#allocation2 + $0x8] sm:$0xff]  ;;  %s4212_s25 = scalar_lea.vmem %s4118_s6, %s3681_s19  ;;  %vm1243_vm4 = vcmask 1043456   ;;  %s3344_s21 = smov 112   ;;  %vm1571_vm5 = vcmask 130112   ;;  %vm1804_vm6 = vcmask 195712  }
  0xc5   : > { %2799 = vmatpush3.bf16.msra.mxu1 %v3041_v2  ;;  %2802 = vmatprep.mubr.msk.bf16.mxu1 %vm3342_vm1, %v3341_v3  ;;  %v3746_v6 = vld [vmem:[#allocation2] sm:$0xff]  ;;  %v3044_v8 = vld [vmem:[%s3691_s2 + $0x8] sm:$0xff]   ;;  %s3345_s10 = smov 104   ;;  %s3346_s16 = smov 8   ;;  %vm2037_vm7 = vcmask 261312   ;;  %vm2267_vm8 = vcmask 523264  }
  0xc6   : > { %2800 = vmatprep.subr.bf16.mxu1 %v3341_v3  ;;  %2794 = vmatprep.mubr.msk.bf16.mxu0 %vm3342_vm1, %v3341_v3  ;;  %v918_v9 = vpack.c.bf16 %v3748_v7, %v3746_v6  ;;  %v3045_v10 = vld [vmem:[%s3699_s22] sm:$0xff]   ;;  %v3046_v11 = vld [vmem:[%s3699_s22 + $0x8] sm:$0xff]   ;;  %s3343_s22 = smov 120   ;;  %s3347_s27 = smov 16  }
  0xc7   : > { %2791 = vmatpush3.bf16.msra.mxu0 %v3043_v5  ;;  %v2683_v12 = vld [vmem:[%s4210_s0] ss:$0 sm:$0xff]  ;;  %s3348_s17 = smov 24   ;;  %s4213_s9 = sld [smem:[#allocation34_spill]] }
  0xc8   : > { %2792 = vmatprep.subr.bf16.mxu0 %v3341_v3  ;;  %v2679_v17 = vld [vmem:[%s4211_s18] ss:$0 sm:$0xff]  ;;  %s4215_s12 = sld [smem:[#allocation28_spill]]  ;;  %s4217_s1 = sld [smem:[#allocation27_spill]] }
  0xc9   : > { %2801 = vmatpush3.bf16.msra.mxu1 %v3042_v4  ;;  %v2687_v36 = vld [vmem:[%s4212_s25] ss:$0 sm:$0xff]  ;;  %p2725_p7 = scmp.ne.s32.totalorder %s3323_s30, 1 }
  0xca   : > { %2814 = vmatprep.subr.bf16.mxu1 %v3341_v3 }
  0xcb   : > { %2793 = vmatpush3.bf16.msra.mxu0 %v3044_v8 }
  0xcc   : > { %2803 = vmatmul.mubr.msk.bf16.vlgmr.msra.gmra.mrb[0].mxu1 %vm942_vm2, %v918_v9  ;;  %2806 = vmatprep.subr.bf16.mxu0 %v3341_v3 }
  0xcd   : > { %2816 = vmatprep.mubr.msk.bf16.mxu1 %vm3342_vm1, %v3341_v3  ;;  %s4214_s11 = scalar_lea.vmem %s4213_s9, %s3681_s19 }
  0xce   : > { %2795 = vmatmul.mubr.msk.bf16.vlgmr.msra.gmra.mrb[0].mxu0 %vm942_vm2, %v918_v9 }
  0xcf   : > { %2807 = vmatpush3.bf16.msra.mxu0 %v3045_v10  ;;  %2810 = vmatprep.mubr.msk.bf16.mxu0 %vm3342_vm1, %v3341_v3 }
  0xd0   : > { %2808 = vmatprep.subr.bf16.mxu0 %v3341_v3 }
  0xd3   : > { %2809 = vmatpush3.bf16.msra.mxu0 %v3046_v11 }
  0xd4   : > { %2820 = vmatprep.subr.bf16.mxu0 %v3341_v3 }
  0xd6   : > { %2811 = vmatmul.mubr.msk.bf16.vlgmr.msra.gmra.mrb[4].mxu0 %vm942_vm2, %v918_v9 }
  0xd7   : > { %2822 = vmatprep.mubr.msk.bf16.mxu0 %vm3342_vm1, %v3341_v3 }
 0x19f   : > { %v1044_v13 = vpop.f32.mrb[0].mxu1 }
 0x1a0   : > { %v1045_v14 = vadd.f32 %v2683_v12, %v1044_v13  ;;  %v2804_v15 = vpop.f32.mrb[1].mxu1 }
 0x1a1   : > { %v1047_v16 = vpop.f32.mrb[2].mxu1  ;;  %v980_v18 = vpop.f32.mrb[0].mxu0 }
 0x1a2   : > { %v3781_v19 = vpack.c.bf16 %v1045_v14, %v1045_v14  ;;  %v1048_v20 = vadd.f32 %v2683_v12, %v1047_v16  ;;  %v2805_v21 = vpop.f32.mrb[3].mxu1  ;;  %v2796_v22 = vpop.f32.mrb[1].mxu0  ;;  %v981_v25 = vadd.f32 %v2679_v17, %v980_v18 }
 0x1a3   : > { %v983_v23 = vpop.f32.mrb[2].mxu0 }
 0x1a4   : > { %v3783_v24 = vpack.c.bf16 %v1048_v20, %v1048_v20  ;;  %v1126_v26 = vsel %vm1121_vm3, %v3781_v19, 0  ;;  %v2797_v27 = vpop.f32.mrb[3].mxu0  ;;  %v3792_v29 = vpack.c.bf16 %v981_v25, %v981_v25  ;;  %v984_v30 = vadd.f32 %v2679_v17, %v983_v23 }
 0x1a5   : > { %2815 = vmatpush3.bf16.xpose.msra.mxu1 %v1126_v26 }
 0x1a6   : > { %1391 = vrot.lane.b32.xlu1 %v3783_v24, %s3343_s22  ;;  %v1172_v28 = vsel %vm1121_vm3, %v3783_v24, 0  ;;  %2826 = vmatprep.subr.bf16.mxu1 %v3341_v3  ;;  %v3795_v34 = vpack.c.bf16 %v984_v30, %v984_v30 }
 0x1a7   : > { %2821 = vmatpush3.bf16.xpose.msra.mxu0 %v1172_v28 }
 0x1a8   : > { %2832 = vmatprep.subr.bf16.mxu0 %v3341_v3 }
 0x1a9   : > { %v1108_v31 = vpop.f32.mrb[4].mxu0 }
 0x1aa   : > { %v2812_v32 = vpop.f32.mrb[5].mxu0  ;;  %v1109_v37 = vadd.f32 %v2687_v36, %v1108_v31 }
 0x1ab   : > { %v1111_v33 = vpop.f32.mrb[6].mxu0 }
 0x1ac   : > { %2817 = vmatmul.mubr.msk.bf16.vlgmr.msra.gmra.mrb[4].mxu1 %vm1121_vm3, %v3792_v29  ;;  %v2813_v35 = vpop.f32.mrb[7].mxu0  ;;  %v1112_v38 = vadd.f32 %v2687_v36, %v1111_v33  ;;  %v3810_v39 = vpack.c.bf16 %v1109_v37, %v1109_v37 }
 0x1ad   : > { %2828 = vmatprep.mubr.msk.bf16.mxu1 %vm3342_vm1, %v3341_v3 }
 0x1ae   : > { %2823 = vmatmul.mubr.msk.bf16.vlgmr.msra.gmra.mrb[8].mxu0 %vm1121_vm3, %v3795_v34  ;;  %v3812_v40 = vpack.c.bf16 %v1112_v38, %v1112_v38  ;;  %v1245_v41 = vsel %vm1243_vm4, %v3810_v39, 0 }
 0x1af   : > { %2834 = vmatprep.mubr.msk.bf16.mxu0 %vm3342_vm1, %v3341_v3  ;;  %2827 = vmatpush3.bf16.msra.mxu1 %v1245_v41 }
 0x1b0   : > { %v1291_v42 = vsel %vm1243_vm4, %v3812_v40, 0  ;;  %2838 = vmatprep.subr.bf16.mxu1 %v3341_v3 }
 0x1b1   : > { %2833 = vmatpush3.bf16.msra.mxu0 %v1291_v42 }
 0x1b2   : > { %2844 = vmatprep.subr.bf16.mxu0 %v3341_v3 }
 0x218   : > { %v1392_v63 = vpop.permute.xlu1 %1391 }
 0x219   : > { %v1397_v13 = vsel %vm1121_vm3, %v1392_v63, 0 }
 0x27f   : > { %v1162_v43 = vpop.f32.mrb[4].mxu1 }
 0x280   : > { %v2818_v44 = vpop.f32.mrb[5].mxu1  ;;  %v1214_v45 = vsel %vm1121_vm3, %v1162_v43, -inf }
 0x281   : > { %1215 = vmax.xlane.f32.xlu0 %v1214_v45  ;;  %v1165_v46 = vpop.f32.mrb[6].mxu1  ;;  %v1208_v47 = vpop.f32.mrb[8].mxu0 }
 0x282   : > { %v2819_v48 = vpop.f32.mrb[7].mxu1  ;;  %v2824_v49 = vpop.f32.mrb[9].mxu0  ;;  %v1217_v52 = vsel %vm1121_vm3, %v1208_v47, -inf }
 0x283   : > { %v1211_v50 = vpop.f32.mrb[10].mxu0 }
 0x284   : > { %v2825_v51 = vpop.f32.mrb[11].mxu0 }
 0x285   : > { %1218 = vmax.xlane.f32.xlu0 %v1217_v52 }
 0x29b   : > { %1339 = vrot.lane.b32.xlu0 %v3781_v19, %s3343_s22 }
 0x30e   : > { %v1216_v53 = vpop.xlane.xlu0 %1215 }
 0x30f   : > { %v1220_v54 = vsub.f32 %v1162_v43, %v1216_v53 }
 0x311   : > { %v1222_v55 = vmul.f32 1.442695, %v1220_v54 }
 0x312   : > { %v1219_v56 = vpop.xlane.xlu0 %1218 }
 0x313   : > { %3055 = vpow2.f32 %v1222_v55  ;;  %v1221_v57 = vsub.f32 %v1208_v47, %v1219_v56 }
 0x315   : > { %v1224_v58 = vmul.f32 1.442695, %v1221_v57 }
 0x316   : > { %v1340_v5 = vpop.permute.xlu0 %1339 }
 0x317   : > { %3057 = vpow2.f32 %v1224_v58  ;;  %v1345_v10 = vsel %vm1121_vm3, %v1340_v5, 0 }
 0x31d   : > { %v3056_v59 = vpop.eup %3055 }
 0x31e   : > { %v1226_v60 = vsel %vm1121_vm3, %v3056_v59, 0.0 }
 0x31f   : > { %1227 = vadd.xlane.f32.xlu1 %v1226_v60 }
 0x321   : > { %v3058_v61 = vpop.eup %3057 }
 0x322   : > { %v1229_v62 = vsel %vm1121_vm3, %v3058_v61, 0.0 }
 0x323   : > { %1230 = vadd.xlane.f32.xlu1 %v1229_v62 }
 0x334   : > { %1336 = vrot.lane.b32.xlu1 %v3792_v29, %s3343_s22 }
 0x338   : > { %1388 = vrot.lane.b32.xlu1 %v3795_v34, %s3343_s22 }
 0x3ac   : > { %v1228_v0 = vpop.xlane.xlu1 %1227 }
 0x3ad   : > { %3059 = vrcp.f32 %v1228_v0 }
 0x3b0   : > { %v1231_v1 = vpop.xlane.xlu1 %1230 }
 0x3b1   : > { %3061 = vrcp.f32 %v1231_v1 }
 0x3b4   : > { %v1337_v14 = vpop.permute.xlu1 %1336 }
 0x3b7   : > { %v3060_v2 = vpop.eup %3059 }
 0x3b8   : > { %v3830_v4 = vmul.f32 %v3060_v2, %v3056_v59  ;;  %v1389_v15 = vpop.permute.xlu1 %1388 }
 0x3ba   : > { %v1238_v8 = vpack.c.bf16 %v3830_v4, %v3830_v4 }
 0x3bb   : > { %v3062_v9 = vpop.eup %3061 }
 0x3bc   : > { %v3835_v11 = vmul.f32 %v3062_v9, %v3058_v61  ;;  %2829 = vmatmul.mubr.msk.bf16.vlgmr.msra.gmra.mrb[8].mxu1 %vm1121_vm3, %v1238_v8 }
 0x3bd   : > { %2839 = vmatpush3.bf16.xpose.msra.mxu1 %v1345_v10  ;;  %2840 = vmatprep.mubr.msk.bf16.mxu1 %vm3342_vm1, %v3341_v3 }
 0x3be   : > { %v1239_v12 = vpack.c.bf16 %v3835_v11, %v3835_v11  ;;  %2850 = vmatprep.subr.bf16.mxu1 %v3341_v3 }
 0x3c0   : > { %2835 = vmatmul.mubr.msk.bf16.vlgmr.msra.gmra.mrb[12].mxu0 %vm1121_vm3, %v1239_v12 }
 0x3c1   : > { %2845 = vmatpush3.bf16.xpose.msra.mxu0 %v1397_v13  ;;  %2846 = vmatprep.mubr.msk.bf16.mxu0 %vm3342_vm1, %v3341_v3 }
 0x3c2   : > { %2856 = vmatprep.subr.bf16.mxu0 %v3341_v3 }
 0x3c4   : > { %2841 = vmatmul.mubr.msk.bf16.vlgmr.msra.gmra.mrb[12].mxu1 %vm1121_vm3, %v1337_v14 }
 0x3c5   : > { %2852 = vmatprep.mubr.msk.bf16.mxu1 %vm3342_vm1, %v3341_v3 }
 0x3c8   : > { %2847 = vmatmul.mubr.msk.bf16.vlgmr.msra.gmra.mrb[16].mxu0 %vm1121_vm3, %v1389_v15 }
 0x3c9   : > { %2858 = vmatprep.mubr.msk.bf16.mxu0 %vm3342_vm1, %v3341_v3 }
 0x48f   : > { %v1281_v16 = vpop.f32.mrb[8].mxu1 }
 0x490   : > { %1333 = vst.msk [vmem:[#allocation3] sm:$0xff] %vm1121_vm3, %v1281_v16  ;;  %v2830_v17 = vpop.f32.mrb[9].mxu1 }
 0x491   : > { %v1284_v18 = vpop.f32.mrb[10].mxu1 }
 0x492   : > { %v2831_v20 = vpop.f32.mrb[11].mxu1 }
 0x493   : > { %v1327_v21 = vpop.f32.mrb[12].mxu0 }
 0x494   : > { %1334 = vst.msk [vmem:[#allocation3 + $0x8] sm:$0xff] %vm1121_vm3, %v1327_v21  ;;  %v2836_v22 = vpop.f32.mrb[13].mxu0 }
 0x495   : > { %v1330_v23 = vpop.f32.mrb[14].mxu0 }
 0x496   : > { %v2837_v25 = vpop.f32.mrb[15].mxu0 }
 0x497   : > { %v1381_v26 = vpop.f32.mrb[12].mxu1 }
 0x498   : > { %v2842_v27 = vpop.f32.mrb[13].mxu1  ;;  %v1439_v28 = vsel %vm1121_vm3, %v1381_v26, -inf }
 0x499   : > { %1440 = vmax.xlane.f32.xlu0 %v1439_v28  ;;  %v1384_v30 = vpop.f32.mrb[14].mxu1 }
 0x49a   : > { %v2843_v31 = vpop.f32.mrb[15].mxu1 }
 0x49b   : > { %v1433_v32 = vpop.f32.mrb[16].mxu0 }
 0x49c   : > { %v2848_v33 = vpop.f32.mrb[17].mxu0  ;;  %v1442_v35 = vsel %vm1121_vm3, %v1433_v32, -inf }
 0x49d   : > { %1443 = vmax.xlane.f32.xlu1 %v1442_v35  ;;  %v1436_v36 = vpop.f32.mrb[18].mxu0 }
 0x49e   : > { %v2849_v37 = vpop.f32.mrb[19].mxu0 }
 0x4ae   : > { %1515 = vrot.lane.b32.xlu1 %v3812_v40, %s3343_s22 }
 0x4b2   : > { %1576 = vrot.lane.b32.xlu1 %v3781_v19, %s3344_s21 }
 0x4b6   : > { %1626 = vrot.lane.b32.xlu1 %v3783_v24, %s3344_s21 }
 0x4ba   : > { %1624 = vrot.lane.b32.xlu1 %v3795_v34, %s3344_s21 }
 0x526   : > { %v1441_v38 = vpop.xlane.xlu0 %1440 }
 0x527   : > { %v1445_v41 = vsub.f32 %v1381_v26, %v1441_v38 }
 0x529   : > { %v1447_v42 = vmul.f32 1.442695, %v1445_v41 }
 0x52a   : > { %v1444_v43 = vpop.xlane.xlu1 %1443 }
 0x52b   : > { %3063 = vpow2.f32 %v1447_v42  ;;  %v1446_v44 = vsub.f32 %v1433_v32, %v1444_v43 }
 0x52d   : > { %v1449_v45 = vmul.f32 1.442695, %v1446_v44 }
 0x52e   : > { %v1516_v46 = vpop.permute.xlu1 %1515 }
 0x52f   : > { %3065 = vpow2.f32 %v1449_v45  ;;  %v1521_v47 = vsel %vm1243_vm4, %v1516_v46, 0 }
 0x530   : > { %2857 = vmatpush3.bf16.msra.mxu0 %v1521_v47 }
 0x531   : > { %2868 = vmatprep.subr.bf16.mxu0 %v3341_v3 }
 0x532   : > { %v1577_v57 = vpop.permute.xlu1 %1576 }
 0x533   : > { %v1582_v63 = vsel %vm1121_vm3, %v1577_v57, 0 }
 0x535   : > { %v3064_v48 = vpop.eup %3063 }
 0x536   : > { %v1451_v49 = vsel %vm1121_vm3, %v3064_v48, 0.0  ;;  %v1627_v62 = vpop.permute.xlu1 %1626 }
 0x537   : > { %1452 = vadd.xlane.f32.xlu0 %v1451_v49  ;;  %v1632_v1 = vsel %vm1121_vm3, %v1627_v62, 0 }
 0x539   : > { %v3066_v50 = vpop.eup %3065 }
 0x53a   : > { %v1454_v51 = vsel %vm1121_vm3, %v3066_v50, 0.0  ;;  %v1625_v5 = vpop.permute.xlu1 %1624 }
 0x53b   : > { %1455 = vadd.xlane.f32.xlu0 %v1454_v51 }
 0x551   : > { %1466 = vrot.lane.b32.xlu0 %v3810_v39, %s3343_s22 }
 0x555   : > { %1574 = vrot.lane.b32.xlu0 %v3792_v29, %s3344_s21 }
 0x5c4   : > { %v1453_v52 = vpop.xlane.xlu0 %1452 }
 0x5c5   : > { %3067 = vrcp.f32 %v1453_v52 }
 0x5c8   : > { %v1456_v53 = vpop.xlane.xlu0 %1455 }
 0x5c9   : > { %3069 = vrcp.f32 %v1456_v53 }
 0x5cc   : > { %v1467_v54 = vpop.permute.xlu0 %1466 }
 0x5cd   : > { %v1472_v55 = vsel %vm1243_vm4, %v1467_v54, 0 }
 0x5ce   : > { %2851 = vmatpush3.bf16.msra.mxu1 %v1472_v55 }
 0x5cf   : > { %v3068_v56 = vpop.eup %3067  ;;  %2862 = vmatprep.subr.bf16.mxu1 %v3341_v3 }
 0x5d0   : > { %v3876_v58 = vmul.f32 %v3068_v56, %v3064_v48  ;;  %v1575_v2 = vpop.permute.xlu0 %1574 }
 0x5d2   : > { %v1463_v59 = vpack.c.bf16 %v3876_v58, %v3876_v58  ;;  %v1461_v48 = vadd.f32 %v3876_v58, %v3830_v4 }
 0x5d3   : > { %v3070_v60 = vpop.eup %3069 }
 0x5d4   : > { %v3880_v61 = vmul.f32 %v3070_v60, %v3066_v50  ;;  %2853 = vmatmul.mubr.msk.bf16.vlgmr.msra.gmra.mrb[16].mxu1 %vm1121_vm3, %v1463_v59 }
 0x5d5   : > { %2864 = vmatprep.mubr.msk.bf16.mxu1 %vm3342_vm1, %v3341_v3 }
 0x5d6   : > { %v1464_v0 = vpack.c.bf16 %v3880_v61, %v3880_v61  ;;  %v1462_v52 = vadd.f32 %v3880_v61, %v3835_v11 }
 0x5d7   : > { %2863 = vmatpush3.bf16.xpose.msra.mxu1 %v1582_v63 }
 0x5d8   : > { %2859 = vmatmul.mubr.msk.bf16.vlgmr.msra.gmra.mrb[20].mxu0 %vm1121_vm3, %v1464_v0  ;;  %2874 = vmatprep.subr.bf16.mxu1 %v3341_v3 }
 0x5d9   : > { %2869 = vmatpush3.bf16.xpose.msra.mxu0 %v1632_v1  ;;  %2870 = vmatprep.mubr.msk.bf16.mxu0 %vm3342_vm1, %v3341_v3 }
 0x5da   : > { %2880 = vmatprep.subr.bf16.mxu0 %v3341_v3 }
 0x5de   : > { %2865 = vmatmul.mubr.msk.bf16.vlgmr.msra.gmra.mrb[20].mxu1 %vm1121_vm3, %v1575_v2 }
 0x5df   : > { %2876 = vmatprep.mubr.msk.bf16.mxu1 %vm3342_vm1, %v3341_v3 }
 0x5e0   : > { %2871 = vmatmul.mubr.msk.bf16.vlgmr.msra.gmra.mrb[24].mxu0 %vm1121_vm3, %v1625_v5 }
 0x5e1   : > { %2882 = vmatprep.mubr.msk.bf16.mxu0 %vm3342_vm1, %v3341_v3 }
 0x6a7   : > { %v3900_v8 = vpop.f32.mrb[16].mxu1 }
 0x6a8   : > { %v2854_v9 = vpop.f32.mrb[17].mxu1 }
 0x6a9   : > { %v1511_v10 = vpop.f32.mrb[18].mxu1 }
 0x6aa   : > { %v2855_v12 = vpop.f32.mrb[19].mxu1 }
 0x6ab   : > { %v3902_v13 = vpop.f32.mrb[20].mxu0 }
 0x6ac   : > { %v2860_v14 = vpop.f32.mrb[21].mxu0 }
 0x6ad   : > { %v1560_v15 = vpop.f32.mrb[22].mxu0 }
 0x6ae   : > { %v2861_v16 = vpop.f32.mrb[23].mxu0 }
 0x6b1   : > { %v1618_v17 = vpop.f32.mrb[20].mxu1 }
 0x6b2   : > { %v2866_v18 = vpop.f32.mrb[21].mxu1  ;;  %v1674_v20 = vsel %vm1121_vm3, %v1618_v17, -inf }
 0x6b3   : > { %1675 = vmax.xlane.f32.xlu0 %v1674_v20  ;;  %v1621_v21 = vpop.f32.mrb[22].mxu1  ;;  %v1668_v22 = vpop.f32.mrb[24].mxu0 }
 0x6b4   : > { %v2867_v23 = vpop.f32.mrb[23].mxu1  ;;  %v2872_v25 = vpop.f32.mrb[25].mxu0  ;;  %v1677_v26 = vsel %vm1121_vm3, %v1668_v22, -inf }
 0x6b5   : > { %1678 = vmax.xlane.f32.xlu1 %v1677_v26  ;;  %v1671_v27 = vpop.f32.mrb[26].mxu0 }
 0x6b6   : > { %v2873_v28 = vpop.f32.mrb[27].mxu0 }
 0x6c6   : > { %1748 = vrot.lane.b32.xlu1 %v3812_v40, %s3344_s21 }
 0x6ca   : > { %1809 = vrot.lane.b32.xlu1 %v3781_v19, %s3345_s10 }
 0x6ce   : > { %1859 = vrot.lane.b32.xlu1 %v3783_v24, %s3345_s10 }
 0x6d2   : > { %1857 = vrot.lane.b32.xlu1 %v3795_v34, %s3345_s10 }
 0x740   : > { %v1676_v30 = vpop.xlane.xlu0 %1675 }
 0x741   : > { %v1680_v31 = vsub.f32 %v1618_v17, %v1676_v30 }
 0x742   : > { %v1679_v32 = vpop.xlane.xlu1 %1678 }
 0x743   : > { %v1682_v33 = vmul.f32 1.442695, %v1680_v31  ;;  %v1681_v35 = vsub.f32 %v1668_v22, %v1679_v32 }
 0x745   : > { %3071 = vpow2.f32 %v1682_v33  ;;  %v1684_v36 = vmul.f32 1.442695, %v1681_v35 }
 0x746   : > { %v1749_v37 = vpop.permute.xlu1 %1748 }
 0x747   : > { %3073 = vpow2.f32 %v1684_v36  ;;  %v1754_v38 = vsel %vm1243_vm4, %v1749_v37, 0 }
 0x748   : > { %2881 = vmatpush3.bf16.msra.mxu0 %v1754_v38 }
 0x749   : > { %2892 = vmatprep.subr.bf16.mxu0 %v3341_v3 }
 0x74a   : > { %v1810_v47 = vpop.permute.xlu1 %1809 }
 0x74b   : > { %v1815_v55 = vsel %vm1121_vm3, %v1810_v47, 0  ;;  %v3047_v47 = vld [vmem:[%s3665_s23] sm:$0xff]  }
 0x74e   : > { %v1860_v54 = vpop.permute.xlu1 %1859 }
 0x74f   : > { %v3072_v19 = vpop.eup %3071  ;;  %v1865_v57 = vsel %vm1121_vm3, %v1860_v54, 0 }
 0x750   : > { %v1686_v24 = vsel %vm1121_vm3, %v3072_v19, 0.0 }
 0x751   : > { %v3074_v41 = vpop.eup %3073  ;;  %1687 = vadd.xlane.f32.xlu0 %v1686_v24 }
 0x752   : > { %v1689_v34 = vsel %vm1121_vm3, %v3074_v41, 0.0  ;;  %v1858_v58 = vpop.permute.xlu1 %1857 }
 0x755   : > { %1690 = vadd.xlane.f32.xlu0 %v1689_v34 }
 0x76b   : > { %1700 = vrot.lane.b32.xlu0 %v3810_v39, %s3344_s21 }
 0x76f   : > { %1807 = vrot.lane.b32.xlu0 %v3792_v29, %s3345_s10 }
 0x7de   : > { %v1688_v42 = vpop.xlane.xlu0 %1687 }
 0x7df   : > { %3075 = vrcp.f32 %v1688_v42 }
 0x7e2   : > { %v1691_v43 = vpop.xlane.xlu0 %1690 }
 0x7e3   : > { %3077 = vrcp.f32 %v1691_v43 }
 0x7e6   : > { %v1701_v44 = vpop.permute.xlu0 %1700 }
 0x7e7   : > { %v1706_v45 = vsel %vm1243_vm4, %v1701_v44, 0 }
 0x7e8   : > { %2875 = vmatpush3.bf16.msra.mxu1 %v1706_v45 }
 0x7e9   : > { %v3076_v46 = vpop.eup %3075  ;;  %2886 = vmatprep.subr.bf16.mxu1 %v3341_v3 }
 0x7ea   : > { %v1694_v49 = vmul.f32 %v3076_v46, %v3072_v19  ;;  %v1808_v11 = vpop.permute.xlu0 %1807 }
 0x7ec   : > { %v3926_v50 = vadd.f32 %v1694_v49, %v1461_v48  ;;  %v1698_v51 = vpack.c.bf16 %v1694_v49, %v1694_v49  ;;  %v3048_v48 = vld [vmem:[%s3665_s23 + $0x8] sm:$0xff]  }
 0x7ed   : > { %v3078_v29 = vpop.eup %3077 }
 0x7ee   : > { %v1695_v53 = vmul.f32 %v3078_v29, %v3074_v41  ;;  %2877 = vmatmul.mubr.msk.bf16.vlgmr.msra.gmra.mrb[24].mxu1 %vm1121_vm3, %v1698_v51 }
 0x7ef   : > { %2888 = vmatprep.mubr.msk.bf16.mxu1 %vm3342_vm1, %v3341_v3 }
 0x7f0   : > { %v3934_v56 = vadd.f32 %v1695_v53, %v1462_v52  ;;  %v1699_v4 = vpack.c.bf16 %v1695_v53, %v1695_v53 }
 0x7f1   : > { %2887 = vmatpush3.bf16.xpose.msra.mxu1 %v1815_v55 }
 0x7f2   : > { %2883 = vmatmul.mubr.msk.bf16.vlgmr.msra.gmra.mrb[28].mxu0 %vm1121_vm3, %v1699_v4  ;;  %2898 = vmatprep.subr.bf16.mxu1 %v3341_v3 }
 0x7f3   : > { %2893 = vmatpush3.bf16.xpose.msra.mxu0 %v1865_v57  ;;  %2894 = vmatprep.mubr.msk.bf16.mxu0 %vm3342_vm1, %v3341_v3 }
 0x7f4   : > { %2904 = vmatprep.subr.bf16.mxu0 %v3341_v3 }
 0x7f8   : > { %2889 = vmatmul.mubr.msk.bf16.vlgmr.msra.gmra.mrb[28].mxu1 %vm1121_vm3, %v1808_v11 }
 0x7f9   : > { %2900 = vmatprep.mubr.msk.bf16.mxu1 %vm3342_vm1, %v3341_v3 }
 0x7fa   : > { %2895 = vmatmul.mubr.msk.bf16.vlgmr.msra.gmra.mrb[32].mxu0 %vm1121_vm3, %v1858_v58 }
 0x7fb   : > { %2906 = vmatprep.mubr.msk.bf16.mxu0 %vm3342_vm1, %v3341_v3 }
 0x8c1   : > { %v1742_v59 = vpop.f32.mrb[24].mxu1 }
 0x8c2   : > { %v2878_v60 = vpop.f32.mrb[25].mxu1 }
 0x8c3   : > { %v1745_v61 = vpop.f32.mrb[26].mxu1 }
 0x8c4   : > { %v2879_v62 = vpop.f32.mrb[27].mxu1 }
 0x8c5   : > { %v1790_v63 = vpop.f32.mrb[28].mxu0 }
 0x8c6   : > { %v2884_v0 = vpop.f32.mrb[29].mxu0 }
 0x8c7   : > { %v1793_v1 = vpop.f32.mrb[30].mxu0 }
 0x8c8   : > { %v2885_v2 = vpop.f32.mrb[31].mxu0 }
 0x8cb   : > { %v1851_v5 = vpop.f32.mrb[28].mxu1 }
 0x8cc   : > { %v2890_v9 = vpop.f32.mrb[29].mxu1  ;;  %v1907_v10 = vsel %vm1121_vm3, %v1851_v5, -inf }
 0x8cd   : > { %1908 = vmax.xlane.f32.xlu0 %v1907_v10  ;;  %v1854_v12 = vpop.f32.mrb[30].mxu1  ;;  %v1901_v14 = vpop.f32.mrb[32].mxu0 }
 0x8ce   : > { %v2891_v15 = vpop.f32.mrb[31].mxu1  ;;  %v2896_v16 = vpop.f32.mrb[33].mxu0  ;;  %v1910_v17 = vsel %vm1121_vm3, %v1901_v14, -inf }
 0x8cf   : > { %1911 = vmax.xlane.f32.xlu1 %v1910_v17  ;;  %v1904_v18 = vpop.f32.mrb[34].mxu0 }
 0x8d0   : > { %v2897_v20 = vpop.f32.mrb[35].mxu0 }
 0x8e0   : > { %1981 = vrot.lane.b32.xlu1 %v3812_v40, %s3345_s10 }
 0x8e4   : > { %1565 = vrot.lane.b32.xlu1 %v3900_v8, %s3346_s16 }
 0x8e8   : > { %1567 = vrot.lane.b32.xlu1 %v3902_v13, %s3346_s16 }
 0x8ec   : > { %1800 = vrot.lane.b32.xlu1 %v1790_v63, %s3347_s27 }
 0x95a   : > { %v1909_v21 = vpop.xlane.xlu0 %1908 }
 0x95b   : > { %v1913_v22 = vsub.f32 %v1851_v5, %v1909_v21 }
 0x95c   : > { %v1912_v23 = vpop.xlane.xlu1 %1911 }
 0x95d   : > { %v1915_v25 = vmul.f32 1.442695, %v1913_v22  ;;  %v1914_v26 = vsub.f32 %v1901_v14, %v1912_v23  ;;  %v3049_v22 = vld [vmem:[%s4215_s12] sm:$0xff]   ;;  %v3050_v23 = vld [vmem:[%s4215_s12 + $0x8] sm:$0xff]  }
 0x95f   : > { %3079 = vpow2.f32 %v1915_v25  ;;  %v1917_v27 = vmul.f32 1.442695, %v1914_v26  ;;  %v3051_v25 = vld [vmem:[%s3721_s3] sm:$0xff]   ;;  %v3052_v26 = vld [vmem:[%s3721_s3 + $0x8] sm:$0xff]  }
 0x960   : > { %v1982_v28 = vpop.permute.xlu1 %1981 }
 0x961   : > { %3081 = vpow2.f32 %v1917_v27  ;;  %v1987_v40 = vsel %vm1243_vm4, %v1982_v28, 0 }
 0x962   : > { %2905 = vmatpush3.bf16.msra.mxu0 %v1987_v40 }
 0x963   : > { %2918 = vmatprep.subr.bf16.mxu0 %v3341_v3 }
 0x964   : > { %v1566_v8 = vpop.permute.xlu1 %1565 }
 0x965   : > { %1572 = vst.msk [vmem:[#allocation3] sm:$0xff] %vm1571_vm5, %v1566_v8 }
 0x968   : > { %v1568_v13 = vpop.permute.xlu1 %1567 }
 0x969   : > { %v3080_v30 = vpop.eup %3079  ;;  %1573 = vst.msk [vmem:[#allocation3 + $0x8] sm:$0xff] %vm1571_vm5, %v1568_v13 }
 0x96a   : > { %v1919_v31 = vsel %vm1121_vm3, %v3080_v30, 0.0 }
 0x96b   : > { %v3082_v32 = vpop.eup %3081  ;;  %1920 = vadd.xlane.f32.xlu0 %v1919_v31 }
 0x96c   : > { %v1801_v33 = vpop.permute.xlu1 %1800  ;;  %v1922_v35 = vsel %vm1121_vm3, %v3082_v32, 0.0 }
 0x96d   : > { %1806 = vst.msk [vmem:[#allocation3 + $0x8] sm:$0xff] %vm1804_vm6, %v1801_v33  ;;  %v2711_v33 = vld [vmem:[%s894_s14] ss:$0 sm:$0xff]  ;;  %s4219_s14 = scalar_lea.vmem [#allocation10], %s4217_s1 }
 0x96f   : > { %1923 = vadd.xlane.f32.xlu0 %v1922_v35 }
 0x985   : > { %1933 = vrot.lane.b32.xlu0 %v3810_v39, %s3345_s10 }
 0x989   : > { %1798 = vrot.lane.b32.xlu0 %v1742_v59, %s3347_s27  ;;  %v2707_v59 = vld [vmem:[%s4214_s11] ss:$0 sm:$0xff] }
 0x9f8   : > { %v1921_v36 = vpop.xlane.xlu0 %1920 }
 0x9f9   : > { %3083 = vrcp.f32 %v1921_v36 }
 0x9fc   : > { %v1924_v37 = vpop.xlane.xlu0 %1923 }
 0x9fd   : > { %3085 = vrcp.f32 %v1924_v37 }
 0xa00   : > { %v1934_v38 = vpop.permute.xlu0 %1933 }
 0xa01   : > { %v1939_v19 = vsel %vm1243_vm4, %v1934_v38, 0  ;;  %v2712_v38 = vld [vmem:[%s897_s26] ss:$0 sm:$0xff] }
 0xa02   : > { %2899 = vmatpush3.bf16.msra.mxu1 %v1939_v19 }
 0xa03   : > { %v3084_v24 = vpop.eup %3083  ;;  %2910 = vmatprep.subr.bf16.mxu1 %v3341_v3 }
 0xa04   : > { %v1927_v41 = vmul.f32 %v3084_v24, %v3080_v30  ;;  %v1799_v34 = vpop.permute.xlu0 %1798 }
 0xa05   : > { %1805 = vst.msk [vmem:[#allocation3] sm:$0xff] %vm1804_vm6, %v1799_v34 }
 0xa06   : > { %v3967_v39 = vadd.f32 %v1927_v41, %v3926_v50  ;;  %v1931_v42 = vpack.c.bf16 %v1927_v41, %v1927_v41 }
 0xa07   : > { %v3086_v43 = vpop.eup %3085 }
 0xa08   : > { %v1928_v44 = vmul.f32 %v3086_v43, %v3082_v32  ;;  %2901 = vmatmul.mubr.msk.bf16.vlgmr.msra.gmra.mrb[32].mxu1 %vm1121_vm3, %v1931_v42  ;;  %v3053_v42 = vld [vmem:[%s3721_s3 + $0x10] sm:$0xff]   ;;  %v3054_v43 = vld [vmem:[%s3721_s3 + $0x18] sm:$0xff]  }
 0xa09   : > { %2914 = vmatprep.mubr.msk.bf16.mxu1 %vm3342_vm1, %v3341_v3  ;;  %2911 = vmatpush3.bf16.msra.mxu1 %v3047_v47 }
 0xa0a   : > { %v3973_v45 = vadd.f32 %v1928_v44, %v3934_v56  ;;  %v1932_v46 = vpack.c.bf16 %v1928_v44, %v1928_v44  ;;  %2912 = vmatprep.subr.bf16.mxu1 %v3341_v3  ;;  %v2713_v44 = vld [vmem:[%s4219_s14] ss:$0 sm:$0xff] }
 0xa0c   : > { %2907 = vmatmul.mubr.msk.bf16.vlgmr.msra.gmra.mrb[36].mxu0 %vm1121_vm3, %v1932_v46 }
 0xa0d   : > { %2922 = vmatprep.mubr.msk.bf16.mxu0 %vm3342_vm1, %v3341_v3  ;;  %2913 = vmatpush3.bf16.msra.mxu1 %v3048_v48 }
 0xa0e   : > { %2926 = vmatprep.subr.bf16.mxu1 %v3341_v3  ;;  %2919 = vmatpush3.bf16.msra.mxu0 %v3049_v22 }
 0xa0f   : > { %2920 = vmatprep.subr.bf16.mxu0 %v3341_v3 }
 0xa12   : > { %2921 = vmatpush3.bf16.msra.mxu0 %v3050_v23 }
 0xadb   : > { %v1975_v49 = vpop.f32.mrb[32].mxu1 }
 0xadc   : > { %2031 = vrot.lane.b32.xlu0 %v1975_v49, %s3348_s17  ;;  %v2902_v50 = vpop.f32.mrb[33].mxu1 }
 0xadd   : > { %v1978_v51 = vpop.f32.mrb[34].mxu1 }
 0xade   : > { %v2903_v29 = vpop.f32.mrb[35].mxu1 }
 0xadf   : > { %v2023_v52 = vpop.f32.mrb[36].mxu0 }
 0xae0   : > { %2033 = vrot.lane.b32.xlu1 %v2023_v52, %s3348_s17  ;;  %v2908_v53 = vpop.f32.mrb[37].mxu0 }
 0xae1   : > { %v2026_v54 = vpop.f32.mrb[38].mxu0 }
 0xae2   : > { %v2909_v55 = vpop.f32.mrb[39].mxu0 }
 0xb4e   : > { %v2032_v56 = vpop.permute.xlu0 %2031 }
 0xb4f   : > { %2038 = vst.msk [vmem:[#allocation3] sm:$0xff] %vm2037_vm7, %v2032_v56 }
 0xb52   : > { %v2034_v4 = vpop.permute.xlu1 %2033 }
 0xb53   : > { %2039 = vst.msk [vmem:[#allocation3 + $0x8] sm:$0xff] %vm2037_vm7, %v2034_v4 }
 0xb56   : > { %v2040_v57 = vld [vmem:[#allocation3] sm:$0xff] }
 0xb5a   : > { %v2041_v11 = vld [vmem:[#allocation3 + $0x8] sm:$0xff] }
 0xb5b   : > { %v2042_v58 = vpack.c.bf16 %v2041_v11, %v2040_v57 }
 0xb5d   : > { %2915 = vmatmul.mubr.msk.bf16.vlgmr.msra.gmra.mrb[36].mxu1 %vm942_vm2, %v2042_v58 }
 0xb5e   : > { %2934 = vmatprep.mubr.msk.bf16.mxu1 %vm3342_vm1, %v3341_v3  ;;  %2927 = vmatpush3.bf16.msra.mxu1 %v3051_v25  ;;  %v2724_v25 = vld [vmem:[%s903_s24] ss:$0 sm:$0xff] }
 0xb5f   : > { %2928 = vmatprep.subr.bf16.mxu1 %v3341_v3 }
 0xb62   : > { %2929 = vmatpush3.bf16.msra.mxu1 %v3052_v26 }
 0xb63   : > { %2930 = vmatprep.subr.bf16.mxu1 %v3341_v3 }
 0xb66   : > { %2931 = vmatpush3.bf16.msra.mxu1 %v3053_v42 }
 0xb67   : > { %2932 = vmatprep.subr.bf16.mxu1 %v3341_v3  ;;  %v2717_v3 = vld [vmem:[%s891_s28] ss:$0 sm:$0xff] }
 0xb6a   : > { %2933 = vmatpush3.bf16.msra.mxu1 %v3054_v43 }
 0xc30   : > { %v2103_v60 = vpop.f32.mrb[36].mxu1 }
 0xc31   : > { %v2104_v61 = vadd.f32 %v2707_v59, %v2103_v60  ;;  %v2916_v62 = vpop.f32.mrb[37].mxu1 }
 0xc32   : > { %v2106_v63 = vpop.f32.mrb[38].mxu1 }
 0xc33   : > { %v2107_v0 = vadd.f32 %v2707_v59, %v2106_v63  ;;  %v2917_v1 = vpop.f32.mrb[39].mxu1  ;;  %v2110_v2 = vadd.f32 %v2104_v61, %v3746_v6 }
 0xc35   : > { %v2114_v5 = vsel %vm942_vm2, %v2110_v2, 0.0  ;;  %v2111_v9 = vadd.f32 %v2107_v0, %v3748_v7 }
 0xc36   : > { %2115 = vadd.xlane.f32.xlu0 %v2114_v5 }
 0xc37   : > { %v2117_v10 = vsel %vm942_vm2, %v2111_v9, 0.0 }
 0xc38   : > { %2118 = vadd.xlane.f32.xlu1 %v2117_v10 }
 0xcc3   : > { %v2116_v12 = vpop.xlane.xlu0 %2115 }
 0xcc4   : > { %v2121_v14 = vmul.f32 0.03125, %v2116_v12 }
 0xcc5   : > { %v2119_v15 = vpop.xlane.xlu1 %2118 }
 0xcc6   : > { %v2123_v16 = vsub.f32 %v2110_v2, %v2121_v14  ;;  %v2122_v17 = vmul.f32 0.03125, %v2119_v15 }
 0xcc8   : > { %v2124_v18 = vsub.f32 %v2111_v9, %v2122_v17  ;;  %v2125_v20 = vmul.f32 %v2123_v16, %v2123_v16 }
 0xcca   : > { %v2127_v6 = vsel %vm942_vm2, %v2125_v20, 0.0  ;;  %v2126_v21 = vmul.f32 %v2124_v18, %v2124_v18 }
 0xccb   : > { %2128 = vadd.xlane.f32.xlu0 %v2127_v6 }
 0xccc   : > { %v2130_v7 = vsel %vm942_vm2, %v2126_v21, 0.0 }
 0xccf   : > { %2131 = vadd.xlane.f32.xlu0 %v2130_v7  ;;  %v2723_v7 = vld [vmem:[%s900_s7] ss:$0 sm:$0xff] }
 0xd58   : > { %v2129_v27 = vpop.xlane.xlu0 %2128 }
 0xd59   : > { %v2133_v28 = vmul.f32 0.03125, %v2129_v27 }
 0xd5b   : > { %v2135_v40 = vadd.f32 1e-05, %v2133_v28 }
 0xd5c   : > { %v2132_v8 = vpop.xlane.xlu0 %2131 }
 0xd5d   : > { %3087 = vrsqrt.f32 %v2135_v40  ;;  %v2134_v13 = vmul.f32 0.03125, %v2132_v8 }
 0xd5f   : > { %v2136_v30 = vadd.f32 1e-05, %v2134_v13  ;;  %v2366_v13 = vmul.f32 (!%p2725_p7), 0.25, %v3967_v39 }
 0xd61   : > { %3089 = vrsqrt.f32 %v2136_v30  ;;  %v2367_v30 = vmul.f32 (!%p2725_p7), 0.25, %v3973_v45  ;;  %2368 = vst.msk [vmem:[#allocation13] sm:$0xff] (!%p2725_p7), %vm1121_vm3, %v2366_v13 }
 0xd63   : > { %2369 = vst.msk [vmem:[#allocation13 + $0x8] sm:$0xff] (!%p2725_p7), %vm1121_vm3, %v2367_v30 }
 0xd67   : > { %v3088_v31 = vpop.eup %3087 }
 0xd68   : > { %v2139_v32 = vmul.f32 %v3088_v31, %v2123_v16 }
 0xd6a   : > { %v2147_v36 = vmul.f32 %v2711_v33, %v2139_v32 }
 0xd6b   : > { %v3090_v35 = vpop.eup %3089 }
 0xd6c   : > { %v2140_v37 = vmul.f32 %v3090_v35, %v2124_v18  ;;  %v2155_v24 = vadd.f32 %v2712_v38, %v2147_v36 }
 0xd6e   : > { %v2148_v19 = vmul.f32 %v2711_v33, %v2140_v37 }
 0xd70   : > { %v2156_v41 = vadd.f32 %v2712_v38, %v2148_v19 }
 0xd72   : > { %v2157_v34 = vpack.c.bf16 %v2156_v41, %v2155_v24 }
 0xd74   : > { %2923 = vmatmul.mubr.msk.bf16.vlgmr.msra.gmra.mrb[40].mxu0 %vm942_vm2, %v2157_v34 }
 0xe47   : > { %v2218_v46 = vpop.f32.mrb[40].mxu0 }
 0xe48   : > { %v2219_v47 = vadd.f32 %v2713_v44, %v2218_v46  ;;  %v2924_v48 = vpop.f32.mrb[41].mxu0 }
 0xe49   : > { %v2221_v49 = vpop.f32.mrb[42].mxu0 }
 0xe4a   : > { %v2222_v50 = vadd.f32 %v2713_v44, %v2221_v49  ;;  %v2925_v51 = vpop.f32.mrb[43].mxu0  ;;  %v2225_v29 = vmax.f32 %v2219_v47, 0.0 }
 0xe4c   : > { %v2226_v52 = vmax.f32 %v2222_v50, 0.0 }
 0xe4e   : > { %v2227_v53 = vpack.c.bf16 %v2226_v52, %v2225_v29 }
 0xe50   : > { %2935 = vmatmul.mubr.msk.bf16.vlgmr.msra.gmra.mrb[40].mxu1 %vm2267_vm8, %v2227_v53 }
 0xf23   : > { %v2305_v54 = vpop.f32.mrb[40].mxu1 }
 0xf24   : > { %v2306_v55 = vadd.f32 %v2717_v3, %v2305_v54  ;;  %v2936_v56 = vpop.f32.mrb[41].mxu1 }
 0xf25   : > { %v2308_v4 = vpop.f32.mrb[42].mxu1 }
 0xf26   : > { %v2309_v57 = vadd.f32 %v2717_v3, %v2308_v4  ;;  %v2937_v11 = vpop.f32.mrb[43].mxu1  ;;  %v2312_v58 = vadd.f32 %v2306_v55, %v2155_v24 }
 0xf28   : > { %v2316_v59 = vsel %vm942_vm2, %v2312_v58, 0.0  ;;  %v2313_v60 = vadd.f32 %v2309_v57, %v2156_v41 }
 0xf29   : > { %2317 = vadd.xlane.f32.xlu0 %v2316_v59 }
 0xf2a   : > { %v2319_v61 = vsel %vm942_vm2, %v2313_v60, 0.0 }
 0xf2b   : > { %2320 = vadd.xlane.f32.xlu1 %v2319_v61 }
 0xfb6   : > { %v2318_v62 = vpop.xlane.xlu0 %2317 }
 0xfb7   : > { %v2322_v63 = vmul.f32 0.03125, %v2318_v62 }
 0xfb8   : > { %v2321_v0 = vpop.xlane.xlu1 %2320 }
 0xfb9   : > { %v2324_v1 = vsub.f32 %v2312_v58, %v2322_v63  ;;  %v2323_v2 = vmul.f32 0.03125, %v2321_v0 }
 0xfbb   : > { %v2325_v5 = vsub.f32 %v2313_v60, %v2323_v2  ;;  %v2326_v9 = vmul.f32 %v2324_v1, %v2324_v1 }
 0xfbd   : > { %v2328_v10 = vsel %vm942_vm2, %v2326_v9, 0.0  ;;  %v2327_v12 = vmul.f32 %v2325_v5, %v2325_v5 }
 0xfbe   : > { %2329 = vadd.xlane.f32.xlu0 %v2328_v10 }
 0xfbf   : > { %v2331_v14 = vsel %vm942_vm2, %v2327_v12, 0.0 }
 0xfc0   : > { %2332 = vadd.xlane.f32.xlu1 %v2331_v14 }
0x104b   : > { %v2330_v15 = vpop.xlane.xlu0 %2329 }
0x104c   : > { %v2334_v16 = vmul.f32 0.03125, %v2330_v15 }
0x104d   : > { %v2333_v17 = vpop.xlane.xlu1 %2332 }
0x104e   : > { %v2336_v18 = vadd.f32 1e-05, %v2334_v16  ;;  %v2335_v20 = vmul.f32 0.03125, %v2333_v17 }
0x1050   : > { %3091 = vrsqrt.f32 %v2336_v18  ;;  %v2337_v6 = vadd.f32 1e-05, %v2335_v20 }
0x1052   : > { %3093 = vrsqrt.f32 %v2337_v6 }
0x105a   : > { %v3092_v21 = vpop.eup %3091 }
0x105b   : > { %v2340_v22 = vmul.f32 %v3092_v21, %v2324_v1 }
0x105c   : > { %v3094_v23 = vpop.eup %3093 }
0x105d   : > { %v2348_v26 = vmul.f32 %v2723_v7, %v2340_v22  ;;  %v2341_v27 = vmul.f32 %v3094_v23, %v2325_v5  ;;  %2363 = sbr.rel (%p2725_p7) target bundleno = 4196 (0x1064), region = 112 }
0x105f   : > { %v2356_v28 = vadd.f32 %v2724_v25, %v2348_v26  ;;  %v2349_v40 = vmul.f32 %v2723_v7, %v2341_v27 }
0x1061   : > { %2358 = vst.msk [vmem:[#allocation2] sm:$0xff] %vm942_vm2, %v2356_v28  ;;  %v2357_v8 = vadd.f32 %v2724_v25, %v2349_v40  ;;  %2364 = vst.msk [vmem:[#allocation12] sm:$0xff] (!%p2725_p7), %vm942_vm2, %v2356_v28 }
0x1063   : > { %2359 = vst.msk [vmem:[#allocation2 + $0x8] sm:$0xff] %vm942_vm2, %v2357_v8  ;;  %2365 = vst.msk [vmem:[#allocation12 + $0x8] sm:$0xff] (!%p2725_p7), %vm942_vm2, %v2357_v8 }
0x1064 PF: > { %s4223_s7 = sld [smem:[#allocation26_spill]]  ;;  %s3349_s19 = smov [#allocation12]  }
0x1065   : > { %s2379_s24 = sshll.u32 %s3349_s19, 4  ;;  %s3350_s30 = smov [#allocation13]   ;;  %s2380_s24 = int_to_ptr.vmem [resolvable:$true] %s2379_s24 }
0x1066   : > { %s2395_s17 = sshll.u32 %s3350_s30, 4  ;;  %s3213_s23 = scalar_lea.vmem %s2380_s24, 256  ;;  %s2396_s17 = int_to_ptr.vmem [resolvable:$true] %s2395_s17 }
0x1067   : > { %p3214_p12 = scmp.ne.s32.totalorder %s2380_s24, %s3213_s23  ;;  %p3220_p13 = scmp.lt.s32.totalorder %s2380_s24, %s2380_s24 }
0x1068   : > { %p3221_p2 = scmp.lt.s32.totalorder %s3213_s23, %s3213_s23 }
0x106a   : > { %p2973_p9 = scmp.eq.s32.totalorder %s4223_s7, 1  ;;  %p3222_p5 = por %p3221_p2, %p3220_p13 }
0x106c   : > { %p3215_p10 = pnand %p3214_p12, %p2973_p9 }
0x106e   : > { %p3216_p6 = pneg %p3215_p10 }
0x1070   : > { %p3223_p3 = pnand %p3222_p5, %p3216_p6 }
0x1072   : > { %3226 = shalt.err (!%p3223_p3)
}
0x1073   : > { %s4224_s11 = sld [smem:[#allocation43_spill]] }
0x1079   : > { %s3227_s12 = scalar_lea.hbm %s4224_s11, 256 }
0x107a   : > { %p3228_p11 = scmp.ne.s32.totalorder %s4224_s11, %s3227_s12  ;;  %p3233_p1 = scmp.lt.u32.totalorder %s3227_s12, %s4224_s11 }
0x107c   : > { %p3229_p8 = pnand %p3228_p11, %p2973_p9 }
0x107e   : > { %p3230_p0 = pneg %p3229_p8 }
0x1080   : > { %p3235_p4 = pnand %p3233_p1, %p3230_p0 }
0x1082   : > { %3238 = shalt.err (!%p3235_p4)
}
0x1083   : > { %s3351_s2 = smov 128   ;;  %s3239_s14 = scalar_lea.vmem %s2396_s17, 256 }
0x1084   : > { %2949 = dma.vmem_to_hbm [thread:$0]  (%p2973_p9), %s2380_s24, 256, %s4224_s11, [#allocation6], %s3351_s2, %s3351_s2, %s3346_s16  }
0x1085   : > { %p3240_p7 = scmp.ne.s32.totalorder %s2396_s17, %s3239_s14  ;;  %p3246_p6 = scmp.lt.s32.totalorder %s2396_s17, %s2396_s17 }
0x1086   : > { %p3247_p13 = scmp.lt.s32.totalorder %s3239_s14, %s3239_s14 }
0x1087   : > { %p3241_p12 = pnand %p3240_p7, %p2973_p9 }
0x1088   : > { %p3248_p2 = por %p3247_p13, %p3246_p6 }
0x1089   : > { %p3242_p10 = pneg %p3241_p12 }
0x108b   : > { %p3249_p5 = pnand %p3248_p2, %p3242_p10 }
0x108d   : > { %3252 = shalt.err (!%p3249_p5)
}
0x108e   : > { %s4225_s29 = sld [smem:[#allocation44_spill]] }
0x1094   : > { %s4226_s3 = smov %s4225_s29  ;;  %s3253_s28 = scalar_lea.hbm %s4225_s29, 256 }
0x1095   : > { %p3254_p3 = scmp.ne.s32.totalorder %s4226_s3, %s3253_s28  ;;  %p3259_p0 = scmp.lt.u32.totalorder %s3253_s28, %s4226_s3 }
0x1097   : > { %p3255_p11 = pnand %p3254_p3, %p2973_p9 }
0x1099   : > { %p3256_p8 = pneg %p3255_p11 }
0x109b   : > { %p3261_p1 = pnand %p3259_p0, %p3256_p8 }
0x109d   : > { %3264 = shalt.err (!%p3261_p1)
}
0x109e   : > { %2951 = dma.vmem_to_hbm [thread:$0]  (%p2973_p9), %s2396_s17, 256, %s4226_s3, [#allocation14], %s3351_s2, %s3351_s2, %s3346_s16  }
0x109f   : > { %3302 = dma.done.wait (%p2973_p9), [#allocation6], 256  }
0x10a0   : > { %3304 = vsyncadd (%p2973_p9), [#allocation6], 4294967040 }
0x10a1   : > { %3306 = dma.done.wait (%p2973_p9), [#allocation14], 256  }
0x10a2   : > { %3308 = vsyncadd (%p2973_p9), [#allocation14], 4294967040 }
0x10a3 PF: > { %s4227_s30 = sld [smem:[#allocation23_spill]]  ;;  %s4228_s27 = sld [smem:[#allocation20_spill]] }
0x10a4   : > { %s4229_s28 = sld [smem:[#allocation21_spill]]  ;;  %s4230_s29 = sld [smem:[#allocation25_spill]] }
0x10a5   : > { %s4232_s0 = sld [smem:[#allocation24_spill]] }
0x10a9   : > { %s38_s19 = sadd.s32 1, %s4227_s30   ;;  %s4231_s30 = sld [smem:[#allocation22_spill]] }
0x10aa   : > { %p35_p4 = scmp.ge.s32.totalorder %s38_s19, 4  }
0x10ac   :  { %37 = sbr.rel (!%p35_p4) target bundleno = 26 (0x1a), region = 212 }
0x10b3   :  { %2415 = vsyncpa [#allocation5], 1 }
0x10b4   :  { %2417 = vsyncpa [#allocation5 + $0x1], 1 }
0x10b5   :  { %2418 = vsyncpa [#allocation8], 1 }
0x10b6   :  { %2420 = vsyncpa [#allocation8 + $0x1], 1 }
0x10b7   :  { %2421 = vsyncpa [#allocation11], 1 }
0x10b8   :  { %2423 = vsyncpa [#allocation11 + $0x1], 1 }
0x10b9   :  { %2424 = vsyncpa [#allocation6], 1 }
0x10ba   :  { %2426 = vsyncpa [#allocation6 + $0x1], 1 }
0x10bb   :  { %2427 = vsyncpa [#allocation14], 1 }

</bundles_post_ra>
